<compile_context>
chip_gen: v7x
topology: tpu7x:2x2x1
jax: 0.10.0
libtpu: 0.0.40
codegen_flags: <defaults>
</compile_context>

<pallas_src>
import jax
import jax.numpy as jnp
import numpy as np
from jax import lax
from jax.experimental import pallas as pl
from jax.experimental.pallas import tpu as pltpu


def _round_up(x, m):
    return (x + m - 1) // m * m


def _cdiv(a, b):
    return -(-a // b)


def critic_kernel(s_ref, a_ref, w1s_ref, w1a_ref, b1_ref,
                  w2_ref, b2_ref, w3_ref, b3_ref, o_ref):
    # Layer 1: split-W1 matmul replaces torch.cat((s, a), -1) @ W1.
    # bf16 operands -> MXU native on v5e/v6e/v7x; f32 accumulation.
    s_b = s_ref[...].astype(jnp.bfloat16)
    a_b = a_ref[...].astype(jnp.bfloat16)
    h1 = jnp.dot(s_b, w1s_ref[...], preferred_element_type=jnp.float32)
    h1 = h1 + jnp.dot(a_b, w1a_ref[...], preferred_element_type=jnp.float32)
    h1 = jnp.maximum(h1 + b1_ref[...], 0.0)                       # relu(l1(x)), f32

    # Layer 2.
    h2 = jnp.dot(h1.astype(jnp.bfloat16), w2_ref[...],
                 preferred_element_type=jnp.float32) + b2_ref[...]
    h2 = jnp.maximum(h2, 0.0)                                     # relu(l2(y)), f32

    # Layer 3: w3 is PyTorch-native (1, size). Contract last dims of (1, size)
    # and (TB, size) -> (1, TB) so q-values land on lanes (lane-dense store).
    q = lax.dot_general(w3_ref[...], h2.astype(jnp.bfloat16),
                        dimension_numbers=(((1,), (1,)), ((), ())),
                        preferred_element_type=jnp.float32)
    o_ref[...] = (q + b3_ref[0, 0]).astype(o_ref.dtype)           # l3(y)


def _pick_tile(batch, block_b):
    """Batch tile size.

    * batch < 256: one block equal to the full array dims -> no (8,128)
      divisibility constraint, no padding anywhere.
    * batch >= 256: 128-multiple tile (lane-dense (1, tb) output blocks need
      tb % 128 == 0), chosen so nb >= 2 -> both v7x TensorCores get work.
    """
    if batch < 2 * 128:
        return batch
    return max(128, min(block_b, _round_up(_cdiv(batch, 2), 128)))


def critic_forward(s, a, params, *, block_b=256):
    """Pallas-backed forward pass of the TD3 Critic. Returns (B, 1) q-values."""
    w1s, w1a, b1, w2, b2, w3, b3 = params
    B, state_dim = s.shape
    action_dim = a.shape[1]

    block_b = _round_up(block_b, 128)
    tb = _pick_tile(B, block_b)
    nb = _cdiv(B, tb)

    # Constant block index => weights/biases are DMA'd once and stay in VMEM.
    resident = lambda arr: pl.BlockSpec(arr.shape, lambda i: (0, 0))

    out = pl.pallas_call(
        critic_kernel,
        grid=(nb,),
        in_specs=[
            pl.BlockSpec((tb, state_dim), lambda i: (i, 0)),      # s tile
            pl.BlockSpec((tb, action_dim), lambda i: (i, 0)),     # a tile
            resident(w1s), resident(w1a), resident(b1),
            resident(w2), resident(b2), resident(w3),
            pl.BlockSpec(memory_space=pltpu.MemorySpace.SMEM),    # b3 scalar
        ],
        # (1, B) output: q-values along lanes -> full-width lane stores
        # (partial edge block, if any, is masked by Pallas).
        out_specs=pl.BlockSpec((1, tb), lambda i: (0, i)),
        out_shape=jax.ShapeDtypeStruct((1, B), jnp.float32),
        compiler_params=pltpu.CompilerParams(
            dimension_semantics=("parallel",)),                   # 2 TCs on v7x
    )(s, a, w1s, w1a, b1, w2, b2, w3, b3)

    return out.reshape(B, 1)


def init_critic_params(key, state_dim, action_dim, size=256):
    """Deterministic init matching nn.Linear's default U(-1/sqrt(fan_in), +)."""
    def linear(key, fan_in, fan_out):
        kw, kb = jax.random.split(key)
        bound = 1.0 / np.sqrt(fan_in)
        w = jax.random.uniform(kw, (fan_in, fan_out), jnp.float32, -bound, bound)
        b = jax.random.uniform(kb, (1, fan_out), jnp.float32, -bound, bound)
        return w, b

    k1, k2, k3 = jax.random.split(key, 3)
    w1, b1 = linear(k1, state_dim + action_dim, size)
    w2, b2 = linear(k2, size, size)
    w3, b3 = linear(k3, size, 1)

    # Split W1 by input rows so the kernel consumes s and a without a concat.
    # Weights stored bf16 (MXU-native); biases stay f32 for the f32 epilogue.
    w1s = w1[:state_dim].astype(jnp.bfloat16)
    w1a = w1[state_dim:].astype(jnp.bfloat16)
    w2b = w2.astype(jnp.bfloat16)
    # Keep l3's weight in PyTorch layout (1, size) for the lane-dense final layer.
    w3t = w3.T.astype(jnp.bfloat16)
    return (w1s, w1a, b1, w2b, b2, w3t, b3)


if __name__ == "__main__":
    key = jax.random.PRNGKey(0)
    k_s, k_a, k_p = jax.random.split(key, 3)

    # batch chosen so the grid has 2 steps with a partial edge block
    # (exercises the no-pad path and the nb>=2 v7x split).
    batch, state_dim, action_dim, size = 300, 16, 8, 256
    s = jax.random.normal(k_s, (batch, state_dim), jnp.float32)
    a = jax.random.normal(k_a, (batch, action_dim), jnp.float32)
    params = init_critic_params(k_p, state_dim, action_dim, size)

    q = critic_forward(s, a, params)
    jax.block_until_ready(q)
    assert q.shape == (batch, 1)

    w1s, w1a, b1, w2, b2, w3t, b3 = params
    x = jnp.concatenate([s, a], axis=-1)
    w1 = jnp.concatenate([w1s, w1a], axis=0)                       # bf16

    # (a) bf16-operand reference (same math as the kernel) -> tight tolerance.
    h = jnp.maximum(jnp.dot(x.astype(jnp.bfloat16), w1,
                            preferred_element_type=jnp.float32) + b1, 0.0)
    h = jnp.maximum(jnp.dot(h.astype(jnp.bfloat16), w2,
                            preferred_element_type=jnp.float32) + b2, 0.0)
    q_bf16_ref = jnp.dot(h.astype(jnp.bfloat16), w3t.T,
                         preferred_element_type=jnp.float32) + b3
    np.testing.assert_allclose(np.asarray(q), np.asarray(q_bf16_ref),
                               rtol=1e-3, atol=1e-3)

    # (b) full-f32 reference (identical math to the PyTorch module) -> loose
    #     tolerance accounts for the bf16 matmul operands.
    hf = jnp.maximum(x @ w1.astype(jnp.float32) + b1, 0.0)
    hf = jnp.maximum(hf @ w2.astype(jnp.float32) + b2, 0.0)
    q_f32_ref = hf @ w3t.astype(jnp.float32).T + b3
    np.testing.assert_allclose(np.asarray(q), np.asarray(q_f32_ref),
                               rtol=5e-2, atol=5e-2)

    print("KERNEL_OK")
</pallas_src>

<mosaic_0001>
module attributes {stable_mosaic.version = 11 : i64} {
  func.func @critic_kernel(%arg0: i32, %arg1: memref<256x16xf32, #tpu.memory_space<vmem>>, %arg2: memref<256x8xf32, #tpu.memory_space<vmem>>, %arg3: memref<16x256xbf16, #tpu.memory_space<vmem>>, %arg4: memref<8x256xbf16, #tpu.memory_space<vmem>>, %arg5: memref<1x256xf32, #tpu.memory_space<vmem>>, %arg6: memref<256x256xbf16, #tpu.memory_space<vmem>>, %arg7: memref<1x256xf32, #tpu.memory_space<vmem>>, %arg8: memref<1x256xbf16, #tpu.memory_space<vmem>>, %arg9: memref<1x1xf32, #tpu.memory_space<smem>>, %arg10: memref<1x256xf32, #tpu.memory_space<vmem>>) attributes {dimension_semantics = [#tpu.dimension_semantics<parallel>], iteration_bounds = array<i64: 2>, scalar_prefetch = 0 : i64, scratch_operands = 0 : i64, tpu.core_type = #tpu.core_type<tc>, window_params = [{transform_indices = @transform_0, window_bounds = array<i64: 256, 16>}, {transform_indices = @transform_1, window_bounds = array<i64: 256, 8>}, {pipeline_mode = #tpu.pipeline_mode<synchronous>, transform_indices = @transform_2, window_bounds = array<i64: 16, 256>}, {pipeline_mode = #tpu.pipeline_mode<synchronous>, transform_indices = @transform_3, window_bounds = array<i64: 8, 256>}, {pipeline_mode = #tpu.pipeline_mode<synchronous>, transform_indices = @transform_4, window_bounds = array<i64: 1, 256>}, {pipeline_mode = #tpu.pipeline_mode<synchronous>, transform_indices = @transform_5, window_bounds = array<i64: 256, 256>}, {pipeline_mode = #tpu.pipeline_mode<synchronous>, transform_indices = @transform_6, window_bounds = array<i64: 1, 256>}, {pipeline_mode = #tpu.pipeline_mode<synchronous>, transform_indices = @transform_7, window_bounds = array<i64: 1, 256>}, {transform_indices = @transform_8, window_bounds = array<i64: 1, 1>}, {transform_indices = @transform_9, window_bounds = array<i64: 1, 256>}]} {
    %c0 = arith.constant 0 : index
    %c0_0 = arith.constant 0 : index
    %0 = vector.load %arg1[%c0, %c0_0] : memref<256x16xf32, #tpu.memory_space<vmem>>, vector<256x16xf32>
    %1 = arith.truncf %0 : vector<256x16xf32> to vector<256x16xbf16>
    %c0_1 = arith.constant 0 : index
    %c0_2 = arith.constant 0 : index
    %2 = vector.load %arg2[%c0_1, %c0_2] : memref<256x8xf32, #tpu.memory_space<vmem>>, vector<256x8xf32>
    %3 = arith.truncf %2 : vector<256x8xf32> to vector<256x8xbf16>
    %c0_3 = arith.constant 0 : index
    %c0_4 = arith.constant 0 : index
    %4 = vector.load %arg3[%c0_3, %c0_4] : memref<16x256xbf16, #tpu.memory_space<vmem>>, vector<16x256xbf16>
    %cst = arith.constant dense<0.000000e+00> : vector<256x256xf32>
    %5 = tpu.matmul %1, %4, %cst {dimension_numbers = #tpu.dot_dimension_numbers<[1], [0], [0], [1], [0, 0, 1, 1], [], []>} : vector<256x16xbf16>, vector<16x256xbf16>, vector<256x256xf32> -> vector<256x256xf32>
    %c0_5 = arith.constant 0 : index
    %c0_6 = arith.constant 0 : index
    %6 = vector.load %arg4[%c0_5, %c0_6] : memref<8x256xbf16, #tpu.memory_space<vmem>>, vector<8x256xbf16>
    %cst_7 = arith.constant dense<0.000000e+00> : vector<256x256xf32>
    %7 = tpu.matmul %3, %6, %cst_7 {dimension_numbers = #tpu.dot_dimension_numbers<[1], [0], [0], [1], [0, 0, 1, 1], [], []>} : vector<256x8xbf16>, vector<8x256xbf16>, vector<256x256xf32> -> vector<256x256xf32>
    %8 = arith.addf %5, %7 : vector<256x256xf32>
    %c0_8 = arith.constant 0 : index
    %c0_9 = arith.constant 0 : index
    %9 = vector.load %arg5[%c0_8, %c0_9] : memref<1x256xf32, #tpu.memory_space<vmem>>, vector<1x256xf32>
    %10 = vector.broadcast %9 : vector<1x256xf32> to vector<256x256xf32>
    %11 = arith.addf %8, %10 : vector<256x256xf32>
    %cst_10 = arith.constant 0.000000e+00 : f32
    %12 = vector.broadcast %cst_10 : f32 to vector<256x256xf32>
    %13 = arith.maximumf %11, %12 : vector<256x256xf32>
    %14 = arith.truncf %13 : vector<256x256xf32> to vector<256x256xbf16>
    %c0_11 = arith.constant 0 : index
    %c0_12 = arith.constant 0 : index
    %15 = vector.load %arg6[%c0_11, %c0_12] : memref<256x256xbf16, #tpu.memory_space<vmem>>, vector<256x256xbf16>
    %cst_13 = arith.constant dense<0.000000e+00> : vector<256x256xf32>
    %16 = tpu.matmul %14, %15, %cst_13 {dimension_numbers = #tpu.dot_dimension_numbers<[1], [0], [0], [1], [0, 0, 1, 1], [], []>} : vector<256x256xbf16>, vector<256x256xbf16>, vector<256x256xf32> -> vector<256x256xf32>
    %c0_14 = arith.constant 0 : index
    %c0_15 = arith.constant 0 : index
    %17 = vector.load %arg7[%c0_14, %c0_15] : memref<1x256xf32, #tpu.memory_space<vmem>>, vector<1x256xf32>
    %18 = vector.broadcast %17 : vector<1x256xf32> to vector<256x256xf32>
    %19 = arith.addf %16, %18 : vector<256x256xf32>
    %cst_16 = arith.constant 0.000000e+00 : f32
    %20 = vector.broadcast %cst_16 : f32 to vector<256x256xf32>
    %21 = arith.maximumf %19, %20 : vector<256x256xf32>
    %c0_17 = arith.constant 0 : index
    %c0_18 = arith.constant 0 : index
    %22 = vector.load %arg8[%c0_17, %c0_18] : memref<1x256xbf16, #tpu.memory_space<vmem>>, vector<1x256xbf16>
    %23 = arith.truncf %21 : vector<256x256xf32> to vector<256x256xbf16>
    %cst_19 = arith.constant dense<0.000000e+00> : vector<1x256xf32>
    %24 = tpu.matmul %22, %23, %cst_19 {dimension_numbers = #tpu.dot_dimension_numbers<[1], [1], [0], [0], [0, 0, 1, 0], [], []>} : vector<1x256xbf16>, vector<256x256xbf16>, vector<1x256xf32> -> vector<1x256xf32>
    %c0_20 = arith.constant 0 : index
    %c0_21 = arith.constant 0 : index
    %25 = memref.load %arg9[%c0_20, %c0_21] : memref<1x1xf32, #tpu.memory_space<smem>>
    %26 = vector.broadcast %25 : f32 to vector<1x256xf32>
    %27 = arith.addf %24, %26 : vector<1x256xf32>
    %c0_22 = arith.constant 0 : index
    %c0_23 = arith.constant 0 : index
    %28 = vector.load %arg10[%c0_22, %c0_23] : memref<1x256xf32, #tpu.memory_space<vmem>>, vector<1x256xf32>
    tpu.vector_store %arg10[%c0_22, %c0_23], %27 {strides = array<i32>} : memref<1x256xf32, #tpu.memory_space<vmem>>, vector<1x256xf32>,
    return
  }
  func.func @transform_0(%arg0: i32) -> (i32, i32) {
    %c0_i32 = arith.constant 0 : i32
    %c0_i32_0 = arith.constant 0 : i32
    return %arg0, %c0_i32 : i32, i32
  }
  func.func @transform_1(%arg0: i32) -> (i32, i32) {
    %c0_i32 = arith.constant 0 : i32
    %c0_i32_0 = arith.constant 0 : i32
    return %arg0, %c0_i32 : i32, i32
  }
  func.func @transform_2(%arg0: i32) -> (i32, i32) {
    %c0_i32 = arith.constant 0 : i32
    %c0_i32_0 = arith.constant 0 : i32
    %c0_i32_1 = arith.constant 0 : i32
    return %c0_i32, %c0_i32_0 : i32, i32
  }
  func.func @transform_3(%arg0: i32) -> (i32, i32) {
    %c0_i32 = arith.constant 0 : i32
    %c0_i32_0 = arith.constant 0 : i32
    %c0_i32_1 = arith.constant 0 : i32
    return %c0_i32, %c0_i32_0 : i32, i32
  }
  func.func @transform_4(%arg0: i32) -> (i32, i32) {
    %c0_i32 = arith.constant 0 : i32
    %c0_i32_0 = arith.constant 0 : i32
    %c0_i32_1 = arith.constant 0 : i32
    return %c0_i32, %c0_i32_0 : i32, i32
  }
  func.func @transform_5(%arg0: i32) -> (i32, i32) {
    %c0_i32 = arith.constant 0 : i32
    %c0_i32_0 = arith.constant 0 : i32
    %c0_i32_1 = arith.constant 0 : i32
    return %c0_i32, %c0_i32_0 : i32, i32
  }
  func.func @transform_6(%arg0: i32) -> (i32, i32) {
    %c0_i32 = arith.constant 0 : i32
    %c0_i32_0 = arith.constant 0 : i32
    %c0_i32_1 = arith.constant 0 : i32
    return %c0_i32, %c0_i32_0 : i32, i32
  }
  func.func @transform_7(%arg0: i32) -> (i32, i32) {
    %c0_i32 = arith.constant 0 : i32
    %c0_i32_0 = arith.constant 0 : i32
    %c0_i32_1 = arith.constant 0 : i32
    return %c0_i32, %c0_i32_0 : i32, i32
  }
  func.func @transform_8(%arg0: i32) -> (i32, i32) {
    %c0_i32 = arith.constant 0 : i32
    %c0_i32_0 = arith.constant 0 : i32
    %c0_i32_1 = arith.constant 0 : i32
    return %c0_i32, %c0_i32_0 : i32, i32
  }
  func.func @transform_9(%arg0: i32) -> (i32, i32) {
    %c0_i32 = arith.constant 0 : i32
    %c0_i32_0 = arith.constant 0 : i32
    return %c0_i32, %arg0 : i32, i32
  }
}

</mosaic_0001>

<bundles_post_ra>
// kernel: tpu_custom_call.1
= control target key start
LH: loop header
LB: loop body
LE: loop exit
PB: predicated region body
PF: predicated region fallthrough
CT: control target
= control target key end

     0   :  { %s2748_s0 = inlined_call_operand.vmem [shape: f32[300,16], index: 0, kind: input, shape index: {}]   ;;  %s2749_s1 = inlined_call_operand.vmem [shape: f32[300,8], index: 1, kind: input, shape index: {}]   ;;  %s2750_s2 = inlined_call_operand.vmem [shape: bf16[16,256], index: 2, kind: input, shape index: {}]   ;;  %s2751_s3 = inlined_call_operand.vmem [shape: bf16[8,256], index: 3, kind: input, shape index: {}]   ;;  %s2752_s4 = inlined_call_operand.vmem [shape: f32[1,256], index: 4, kind: input, shape index: {}]   ;;  %s2753_s5 = inlined_call_operand.vmem [shape: bf16[256,256], index: 5, kind: input, shape index: {}]   ;;  %s2754_s6 = inlined_call_operand.vmem [shape: f32[1,256], index: 6, kind: input, shape index: {}]   ;;  %s2755_s7 = inlined_call_operand.vmem [shape: bf16[1,256], index: 7, kind: input, shape index: {}]   ;;  %s2756_s8 = inlined_call_operand.<no memory space> [shape: f32[1,1], index: 8, kind: input, shape index: {}]   ;;  %s2757_s9 = inlined_call_operand.hbm [shape: f32[1,300], index: 9, kind: output, shape index: {}]  }
   0x1   :  { %14 = sst [smem:[#allocation2]] %s2756_s8 }
   0x2   :  { %15 = vsyncpa [#allocation4], 0 }
   0x3   :  { %17 = vsyncpa [#allocation4 + $0x1], 0  ;;  %s2219_s11 = smov 0   ;;  %s2221_s12 = smov 0  }
   0x4   :  { %s2223_s13 = smov 0   ;;  %s2225_s14 = smov 0  }
   0x5 LB: > { %s2240_s8 = sadd.s32 4294967295, %s2161_s14   ;;  %s1855_s15 = sadd.s32 4294967294, %s2161_s14   ;;  %s2161_s14 = sphi %s2225_s14, %s2763_s14   ;;  %s2157_s13 = sphi %s2223_s13, %s2762_s13   ;;  %s2153_s12 = sphi %s2221_s12, %s2761_s12   ;;  %s2149_s11 = sphi %s2219_s11, %s2760_s11  }
   0x6   : > { %s2244_s16 = sadd.s32 1, %s2161_s14   ;;  %s229_s17 = sadd.s32 1, %s2157_s13 }
   0x7   : > { %s226_s18 = ssub.s32 %s2161_s14, %s2244_s16  ;;  %p239_p0 = scmp.ne.s32.totalorder %s2157_s13, %s2153_s12 }
   0x8   : > { %p227_p1 = scmp.eq.s32.totalorder %s226_s18, 0  ;;  %p240_p2 = scmp.eq.s32.totalorder %s2240_s8, 1 }
   0x9   : > { %p245_p3 = scmp.ne.s32.totalorder %s2153_s12, %s2149_s11  ;;  %p246_p4 = scmp.eq.s32.totalorder %s1855_s15, 1 }
   0xa   : > { %s2255_s19 = scalar_select %p227_p1, %s2157_s13, %s229_s17  }
   0xb   : > { %p2257_p5 = por %p240_p2, %p239_p0  ;;  %p2261_p6 = por %p246_p4, %p245_p3 }
   0xc   : > { %p1858_p7 = scmp.ge.s32.totalorder %s2161_s14, 1  ;;  %p319_p8 = scmp.lt.s32.totalorder %s2161_s14, 3 }
   0xe   : > { %p320_p9 = pnand %p1858_p7, %p319_p8 }
   0xf   : > { %v500_v0 = vld [vmem:[%s2751_s3] sm:$0xff] (!%p320_p9)  ;;  %vm555_vm0 = vcmask (!%p320_p9), 1043456   ;;  %s2271_s24 = sshll.u32 (!%p320_p9), %s2240_s8, 5  ;;  %v2163_v3 = vmov (!%p320_p9), 0   ;;  %vm506_vm1 = vcmask (!%p320_p9), 64512   ;;  %vm765_vm2 = vcmask (!%p320_p9), 130048  }
  0x10   : > { %323 = sbr.rel (%p320_p9) target bundleno = 978 (0x3d2), region = 56  ;;  %v1865_v1 = vcombine.high (!%p320_p9), %v500_v0, %v500_v0  ;;  %v1864_v2 = vcombine.low (!%p320_p9), %v500_v0, %v500_v0  ;;  %594 = vmatprep.mubr.bf16.mxu0 (!%p320_p9), %v2163_v3  ;;  %p373_p10 = scmp.lt.s32.totalorder (!%p320_p9), %s2271_s24, 37  ;;  %v2050_v4 = vld [vmem:[%s2750_s2 + $0x4] ss:$8 sps:$4 sm:$0xff] (!%p320_p9)   ;;  %v2048_v8 = vld [vmem:[%s2750_s2] ss:$8 sps:$4 sm:$0xff] (!%p320_p9)  }
  0x11   : > { %v2051_v55 = vld [vmem:[%s2753_s5 + $0x4] ss:$8 sps:$4 sm:$0xff] (!%p320_p9)   ;;  %v2053_v56 = vld [vmem:[%s2753_s5] ss:$8 sps:$4 sm:$0xff] (!%p320_p9)   ;;  %v2054_v57 = vld [vmem:[%s2753_s5 + $0x14] ss:$8 sps:$4 sm:$0xff] (!%p320_p9)  }
  0x12   : > { %1866 = vmatprep.subr.msk.bf16.mxu0 (!%p320_p9), %vm555_vm0, %v1865_v1  ;;  %v557_v5 = vsel (!%p320_p9), %vm555_vm0, %v1864_v2, 0  ;;  %1383 = vmatprep.subr.bf16.mxu1 (!%p320_p9), %v2051_v55  ;;  %v2056_v60 = vld [vmem:[%s2753_s5 + $0x10] ss:$8 sps:$4 sm:$0xff] (!%p320_p9)   ;;  %v2057_v62 = vld [vmem:[%s2753_s5 + $0x24] ss:$8 sps:$4 sm:$0xff] (!%p320_p9)   ;;  %s365_s30 = sand.u32 (!%p320_p9), 1, %s2153_s12  }
  0x13   : > { %563 = vmatpush1.bf16.msra.mxu0 (!%p320_p9), %v557_v5  ;;  %1384 = vmatpush1.bf16.msra.mxu1 (!%p320_p9), %v2053_v56  ;;  %v2059_v63 = vld [vmem:[%s2753_s5 + $0x20] ss:$8 sps:$4 sm:$0xff] (!%p320_p9)   ;;  %v2060_v0 = vld [vmem:[%s2753_s5 + $0x34] ss:$8 sps:$4 sm:$0xff] (!%p320_p9)   ;;  %v2093_v56 = vld [vmem:[%s2753_s5 + $0xe4] ss:$8 sps:$4 sm:$0xff] (!%p320_p9)  }
  0x14   : > { %814 = vmatprep.subr.bf16.mxu0 (!%p320_p9), %v2050_v4  ;;  %1385 = vmatprep.subr.bf16.mxu1 (!%p320_p9), %v2054_v57  ;;  %v2062_v4 = vld [vmem:[%s2753_s5 + $0x30] ss:$8 sps:$4 sm:$0xff] (!%p320_p9)   ;;  %v2095_v57 = vld [vmem:[%s2753_s5 + $0xe0] ss:$8 sps:$4 sm:$0xff] (!%p320_p9)   ;;  %s1859_s15 = sshll.u32 (!%p320_p9), %s365_s30, 1 }
  0x17   : > { %s2279_s27 = scalar_select %p373_p10, %s2271_s24, 37  ;;  %1386 = vmatpush1.bf16.msra.mxu1 %v2056_v60 }
  0x18   : > { %1387 = vmatprep.subr.bf16.mxu1 %v2057_v62  ;;  %s1935_s17 = sshll.u32 (%p2257_p5), %s2240_s8, 1 }
  0x19   : > { %s1861_s28 = sshll.u32 %s2279_s27, 3  ;;  %s367_s27 = scalar_lea.vmem [#allocation3], %s1859_s15 }
  0x1a   : > { %s2287_s10 = scalar_lea.vmem %s2749_s1, %s1861_s28  ;;  %s2359_s23 = scalar_lea.vmem %s2748_s0, %s1861_s28 }
  0x1b   : > { %v450_v6 = vld [vmem:[%s2287_s10] sm:$0xff]  ;;  %v451_v7 = vld [vmem:[%s2287_s10 + $0x8] sm:$0xff]  ;;  %v452_v10 = vld [vmem:[%s2287_s10 + $0x10] sm:$0xff]  ;;  %1388 = vmatpush1.bf16.msra.mxu1 %v2059_v63  ;;  %s2694_s28 = scalar_lea.sflag [#allocation4], %s365_s30  ;;  %s1773_s18 = ssub.s32 (%p2257_p5), 3, %s1935_s17 }
  0x1c   : > { %v482_v9 = vpack.c.bf16 %v451_v7, %v450_v6  ;;  %v453_v11 = vld [vmem:[%s2287_s10 + $0x18] sm:$0xff]  ;;  %v454_v13 = vld [vmem:[%s2287_s10 + $0x20] sm:$0xff]  ;;  %v455_v14 = vld [vmem:[%s2287_s10 + $0x28] sm:$0xff]  ;;  %1389 = vmatprep.subr.bf16.mxu1 %v2060_v0  ;;  %p1774_p11 = scmp.lt.s32.totalorder (%p2257_p5), %s1773_s18, 2 }
  0x1d   : > { %v483_v12 = vpack.c.bf16 %v453_v11, %v452_v10  ;;  %v484_v15 = vpack.c.bf16 %v455_v14, %v454_v13  ;;  %v456_v16 = vld [vmem:[%s2287_s10 + $0x30] sm:$0xff]  ;;  %v457_v17 = vld [vmem:[%s2287_s10 + $0x38] sm:$0xff]  ;;  %v458_v19 = vld [vmem:[%s2287_s10 + $0x40] sm:$0xff] }
  0x1e   : > { %1867 = vmatmul.mubr.msk.bf16.vlgmr.msra.gmra.mrb[0].mxu0 %vm506_vm1, %v482_v9  ;;  %v485_v18 = vpack.c.bf16 %v457_v17, %v456_v16  ;;  %v459_v20 = vld [vmem:[%s2287_s10 + $0x48] sm:$0xff]  ;;  %v460_v22 = vld [vmem:[%s2287_s10 + $0x50] sm:$0xff]  ;;  %v461_v23 = vld [vmem:[%s2287_s10 + $0x58] sm:$0xff] }
  0x1f   : > { %815 = vmatpush1.bf16.msra.mxu0 %v2048_v8  ;;  %604 = vmatprep.mubr.bf16.mxu0 %v2163_v3  ;;  %v486_v21 = vpack.c.bf16 %v459_v20, %v458_v19  ;;  %v487_v24 = vpack.c.bf16 %v461_v23, %v460_v22  ;;  %v462_v25 = vld [vmem:[%s2287_s10 + $0x60] sm:$0xff]  ;;  %v463_v26 = vld [vmem:[%s2287_s10 + $0x68] sm:$0xff]  ;;  %v464_v28 = vld [vmem:[%s2287_s10 + $0x70] sm:$0xff] }
  0x20   : > { %v488_v27 = vpack.c.bf16 %v463_v26, %v462_v25  ;;  %v465_v29 = vld [vmem:[%s2287_s10 + $0x78] sm:$0xff]  ;;  %v466_v31 = vld [vmem:[%s2287_s10 + $0x80] sm:$0xff]  ;;  %v467_v32 = vld [vmem:[%s2287_s10 + $0x88] sm:$0xff]  ;;  %1390 = vmatpush1.bf16.msra.mxu1 %v2062_v4 }
  0x21   : > { %v489_v30 = vpack.c.bf16 %v465_v29, %v464_v28  ;;  %v490_v33 = vpack.c.bf16 %v467_v32, %v466_v31  ;;  %v468_v34 = vld [vmem:[%s2287_s10 + $0x90] sm:$0xff]  ;;  %v469_v35 = vld [vmem:[%s2287_s10 + $0x98] sm:$0xff]  ;;  %v470_v37 = vld [vmem:[%s2287_s10 + $0xa0] sm:$0xff] }
  0x22   : > { %v491_v36 = vpack.c.bf16 %v469_v35, %v468_v34  ;;  %v471_v38 = vld [vmem:[%s2287_s10 + $0xa8] sm:$0xff]  ;;  %v472_v40 = vld [vmem:[%s2287_s10 + $0xb0] sm:$0xff]  ;;  %v473_v41 = vld [vmem:[%s2287_s10 + $0xb8] sm:$0xff] }
  0x23   : > { %v492_v39 = vpack.c.bf16 %v471_v38, %v470_v37  ;;  %v493_v42 = vpack.c.bf16 %v473_v41, %v472_v40  ;;  %v474_v43 = vld [vmem:[%s2287_s10 + $0xc0] sm:$0xff]  ;;  %v475_v44 = vld [vmem:[%s2287_s10 + $0xc8] sm:$0xff]  ;;  %v476_v46 = vld [vmem:[%s2287_s10 + $0xd0] sm:$0xff] }
  0x24   : > { %v494_v45 = vpack.c.bf16 %v475_v44, %v474_v43  ;;  %v477_v47 = vld [vmem:[%s2287_s10 + $0xd8] sm:$0xff]  ;;  %v478_v49 = vld [vmem:[%s2287_s10 + $0xe0] sm:$0xff]  ;;  %v479_v50 = vld [vmem:[%s2287_s10 + $0xe8] sm:$0xff] }
  0x25   : > { %v495_v48 = vpack.c.bf16 %v477_v47, %v476_v46  ;;  %v496_v51 = vpack.c.bf16 %v479_v50, %v478_v49  ;;  %v480_v52 = vld [vmem:[%s2287_s10 + $0xf0] sm:$0xff]  ;;  %v481_v53 = vld [vmem:[%s2287_s10 + $0xf8] sm:$0xff]  ;;  %v402_v58 = vld [vmem:[%s2359_s23] sm:$0xff]  ;;  %s1673_s10 = sld [smem:[#allocation2]] }
  0x26   : > { %1868 = vmatmul.mubr.msk.bf16.gmra.mrb[4].mxu0 %vm506_vm1, %v483_v12  ;;  %v497_v54 = vpack.c.bf16 %v481_v53, %v480_v52  ;;  %v403_v59 = vld [vmem:[%s2359_s23 + $0x8] sm:$0xff]  ;;  %v404_v1 = vld [vmem:[%s2359_s23 + $0x10] sm:$0xff]  ;;  %v405_v2 = vld [vmem:[%s2359_s23 + $0x18] sm:$0xff] }
  0x27   : > { %614 = vmatprep.mubr.bf16.mxu0 %v2163_v3  ;;  %v434_v61 = vpack.c.bf16 %v403_v59, %v402_v58  ;;  %v435_v5 = vpack.c.bf16 %v405_v2, %v404_v1  ;;  %v2063_v6 = vld [vmem:[%s2753_s5 + $0x44] ss:$8 sps:$4 sm:$0xff]   ;;  %v2065_v7 = vld [vmem:[%s2753_s5 + $0x40] ss:$8 sps:$4 sm:$0xff]   ;;  %v2066_v8 = vld [vmem:[%s2753_s5 + $0x54] ss:$8 sps:$4 sm:$0xff]  }
  0x28   : > { %1391 = vmatprep.subr.bf16.mxu1 %v2063_v6  ;;  %v406_v9 = vld [vmem:[%s2359_s23 + $0x20] sm:$0xff]  ;;  %v407_v10 = vld [vmem:[%s2359_s23 + $0x28] sm:$0xff]  ;;  %v2068_v11 = vld [vmem:[%s2753_s5 + $0x50] ss:$8 sps:$4 sm:$0xff]  }
  0x29   : > { %1392 = vmatpush1.bf16.msra.mxu1 %v2065_v7  ;;  %v436_v12 = vpack.c.bf16 %v407_v10, %v406_v9  ;;  %v2069_v13 = vld [vmem:[%s2753_s5 + $0x64] ss:$8 sps:$4 sm:$0xff]   ;;  %v2071_v14 = vld [vmem:[%s2753_s5 + $0x60] ss:$8 sps:$4 sm:$0xff]   ;;  %v408_v16 = vld [vmem:[%s2359_s23 + $0x30] sm:$0xff]  ;;  %v1009_v9 = vlaneseq }
  0x2a   : > { %1393 = vmatprep.subr.bf16.mxu1 %v2066_v8  ;;  %v409_v17 = vld [vmem:[%s2359_s23 + $0x38] sm:$0xff]  ;;  %v2075_v20 = vld [vmem:[%s2753_s5 + $0x84] ss:$8 sps:$4 sm:$0xff]   ;;  %v2083_v28 = vld [vmem:[%s2753_s5 + $0xa0] ss:$8 sps:$4 sm:$0xff]  }
  0x2b   : > { %v437_v19 = vpack.c.bf16 %v409_v17, %v408_v16  ;;  %v2078_v22 = vld [vmem:[%s2753_s5 + $0x94] ss:$8 sps:$4 sm:$0xff]   ;;  %v410_v23 = vld [vmem:[%s2359_s23 + $0x40] sm:$0xff]  ;;  %v2080_v25 = vld [vmem:[%s2753_s5 + $0x90] ss:$8 sps:$4 sm:$0xff]   ;;  %v2523_v10 = vshrl.u32 %v1009_v9, 7 }
  0x2c   : > { %v2084_v29 = vld [vmem:[%s2753_s5 + $0xb4] ss:$8 sps:$4 sm:$0xff]   ;;  %v2086_v32 = vld [vmem:[%s2753_s5 + $0xb0] ss:$8 sps:$4 sm:$0xff]   ;;  %v2087_v34 = vld [vmem:[%s2753_s5 + $0xc4] ss:$8 sps:$4 sm:$0xff]  }
  0x2d   : > { %1394 = vmatpush1.bf16.msra.mxu1 %v2068_v11  ;;  %v413_v31 = vld [vmem:[%s2359_s23 + $0x58] sm:$0xff]  ;;  %v2089_v35 = vld [vmem:[%s2753_s5 + $0xc0] ss:$8 sps:$4 sm:$0xff]   ;;  %v416_v40 = vld [vmem:[%s2359_s23 + $0x70] sm:$0xff]  ;;  %v1011_v11 = vsub.s32 0, %v2523_v10  ;;  %vm1761_vm3 = vcmp.lt.s32.totalorder %v1009_v9, 256 }
  0x2e   : > { %1869 = vmatmul.mubr.msk.bf16.gmra.mrb[8].mxu0 %vm506_vm1, %v484_v15  ;;  %1395 = vmatprep.subr.bf16.mxu1 %v2069_v13  ;;  %v2072_v15 = vld [vmem:[%s2753_s5 + $0x74] ss:$8 sps:$4 sm:$0xff]   ;;  %v414_v37 = vld [vmem:[%s2359_s23 + $0x60] sm:$0xff]  ;;  %v415_v38 = vld [vmem:[%s2359_s23 + $0x68] sm:$0xff]  ;;  %v1015_v13 = vsub.s32 1, %v2523_v10 }
  0x2f   : > { %624 = vmatprep.mubr.bf16.mxu0 %v2163_v3  ;;  %v417_v41 = vld [vmem:[%s2359_s23 + $0x78] sm:$0xff]  ;;  %v418_v43 = vld [vmem:[%s2359_s23 + $0x80] sm:$0xff]  ;;  %v419_v44 = vld [vmem:[%s2359_s23 + $0x88] sm:$0xff] }
  0x30   : > { %v420_v46 = vld [vmem:[%s2359_s23 + $0x90] sm:$0xff]  ;;  %v421_v47 = vld [vmem:[%s2359_s23 + $0x98] sm:$0xff]  ;;  %v422_v49 = vld [vmem:[%s2359_s23 + $0xa0] sm:$0xff] }
  0x31   : > { %1396 = vmatpush1.bf16.msra.mxu1 %v2071_v14  ;;  %v423_v50 = vld [vmem:[%s2359_s23 + $0xa8] sm:$0xff]  ;;  %v424_v52 = vld [vmem:[%s2359_s23 + $0xb0] sm:$0xff]  ;;  %v425_v53 = vld [vmem:[%s2359_s23 + $0xb8] sm:$0xff] }
  0x32   : > { %1397 = vmatprep.subr.bf16.mxu1 %v2072_v15  ;;  %v445_v55 = vpack.c.bf16 %v425_v53, %v424_v52  ;;  %v2096_v58 = vld [vmem:[%s2753_s5 + $0xf4] ss:$8 sps:$4 sm:$0xff]   ;;  %v426_v59 = vld [vmem:[%s2359_s23 + $0xc0] sm:$0xff]  ;;  %v427_v60 = vld [vmem:[%s2359_s23 + $0xc8] sm:$0xff] }
  0x33   : > { %v446_v62 = vpack.c.bf16 %v427_v60, %v426_v59  ;;  %v428_v63 = vld [vmem:[%s2359_s23 + $0xd0] sm:$0xff]  ;;  %v429_v0 = vld [vmem:[%s2359_s23 + $0xd8] sm:$0xff]  ;;  %v430_v2 = vld [vmem:[%s2359_s23 + $0xe0] sm:$0xff] }
  0x34   : > { %v447_v1 = vpack.c.bf16 %v429_v0, %v428_v63  ;;  %v431_v4 = vld [vmem:[%s2359_s23 + $0xe8] sm:$0xff]  ;;  %v432_v6 = vld [vmem:[%s2359_s23 + $0xf0] sm:$0xff]  ;;  %v433_v7 = vld [vmem:[%s2359_s23 + $0xf8] sm:$0xff] }
  0x35   : > { %v449_v8 = vpack.c.bf16 %v433_v7, %v432_v6 }
  0x36   : > { %1870 = vmatmul.mubr.msk.bf16.gmra.mrb[12].mxu0 %vm506_vm1, %v485_v18  ;;  %v2074_v18 = vld [vmem:[%s2753_s5 + $0x70] ss:$8 sps:$4 sm:$0xff]  }
  0x37   : > { %634 = vmatprep.mubr.bf16.mxu0 %v2163_v3  ;;  %1398 = vmatpush1.bf16.msra.mxu1 %v2074_v18 }
  0x38   : > { %1399 = vmatprep.subr.bf16.mxu1 %v2075_v20 }
  0x3e   : > { %1871 = vmatmul.mubr.msk.bf16.gmra.mrb[16].mxu0 %vm506_vm1, %v486_v21  ;;  %v2077_v21 = vld [vmem:[%s2753_s5 + $0x80] ss:$8 sps:$4 sm:$0xff]  }
  0x3f   : > { %644 = vmatprep.mubr.bf16.mxu0 %v2163_v3  ;;  %1400 = vmatpush1.bf16.msra.mxu1 %v2077_v21 }
  0x40   : > { %1401 = vmatprep.subr.bf16.mxu1 %v2078_v22 }
  0x43   : > { %1402 = vmatpush1.bf16.msra.mxu1 %v2080_v25 }
  0x46   : > { %1872 = vmatmul.mubr.msk.bf16.gmra.mrb[20].mxu0 %vm506_vm1, %v487_v24  ;;  %v411_v24 = vld [vmem:[%s2359_s23 + $0x48] sm:$0xff] }
  0x47   : > { %654 = vmatprep.mubr.bf16.mxu0 %v2163_v3  ;;  %v438_v26 = vpack.c.bf16 %v411_v24, %v410_v23 }
  0x4e   : > { %1873 = vmatmul.mubr.msk.bf16.gmra.mrb[24].mxu0 %vm506_vm1, %v488_v27  ;;  %v2081_v27 = vld [vmem:[%s2753_s5 + $0xa4] ss:$8 sps:$4 sm:$0xff]  }
  0x4f   : > { %664 = vmatprep.mubr.bf16.mxu0 %v2163_v3  ;;  %1403 = vmatprep.subr.bf16.mxu1 %v2081_v27 }
  0x50   : > { %1404 = vmatpush1.bf16.msra.mxu1 %v2083_v28 }
  0x51   : > { %1405 = vmatprep.subr.bf16.mxu1 %v2084_v29 }
  0x54   : > { %1406 = vmatpush1.bf16.msra.mxu1 %v2086_v32 }
  0x55   : > { %1407 = vmatprep.subr.bf16.mxu1 %v2087_v34 }
  0x56   : > { %1874 = vmatmul.mubr.msk.bf16.gmra.mrb[28].mxu0 %vm506_vm1, %v489_v30  ;;  %v412_v30 = vld [vmem:[%s2359_s23 + $0x50] sm:$0xff] }
  0x57   : > { %674 = vmatprep.mubr.bf16.mxu0 %v2163_v3 }
  0x58   : > { %1408 = vmatpush1.bf16.msra.mxu1 %v2089_v35 }
  0x5e   : > { %1875 = vmatmul.mubr.msk.bf16.gmra.mrb[32].mxu0 %vm506_vm1, %v490_v33  ;;  %v439_v33 = vpack.c.bf16 %v413_v31, %v412_v30 }
  0x5f   : > { %684 = vmatprep.mubr.bf16.mxu0 %v2163_v3 }
  0x66   : > { %1876 = vmatmul.mubr.msk.bf16.gmra.mrb[36].mxu0 %vm506_vm1, %v491_v36  ;;  %v2090_v36 = vld [vmem:[%s2753_s5 + $0xd4] ss:$8 sps:$4 sm:$0xff]  }
  0x67   : > { %694 = vmatprep.mubr.bf16.mxu0 %v2163_v3  ;;  %1409 = vmatprep.subr.bf16.mxu1 %v2090_v36 }
  0x6e   : > { %1877 = vmatmul.mubr.msk.bf16.gmra.mrb[40].mxu0 %vm506_vm1, %v492_v39  ;;  %v440_v39 = vpack.c.bf16 %v415_v38, %v414_v37 }
  0x6f   : > { %704 = vmatprep.mubr.bf16.mxu0 %v2163_v3 }
  0x76   : > { %1878 = vmatmul.mubr.msk.bf16.gmra.mrb[44].mxu0 %vm506_vm1, %v493_v42  ;;  %v441_v42 = vpack.c.bf16 %v417_v41, %v416_v40 }
  0x77   : > { %714 = vmatprep.mubr.bf16.mxu0 %v2163_v3 }
  0x7e   : > { %1879 = vmatmul.mubr.msk.bf16.gmra.mrb[48].mxu0 %vm506_vm1, %v494_v45  ;;  %v442_v45 = vpack.c.bf16 %v419_v44, %v418_v43 }
  0x7f   : > { %724 = vmatprep.mubr.bf16.mxu0 %v2163_v3 }
  0x86   : > { %1880 = vmatmul.mubr.msk.bf16.gmra.mrb[52].mxu0 %vm506_vm1, %v495_v48  ;;  %v443_v48 = vpack.c.bf16 %v421_v47, %v420_v46 }
  0x87   : > { %734 = vmatprep.mubr.bf16.mxu0 %v2163_v3 }
  0x8e   : > { %1881 = vmatmul.mubr.msk.bf16.gmra.mrb[56].mxu0 %vm506_vm1, %v496_v51  ;;  %v444_v51 = vpack.c.bf16 %v423_v50, %v422_v49 }
  0x8f   : > { %744 = vmatprep.mubr.bf16.mxu0 %v2163_v3 }
  0x96   : > { %1882 = vmatmul.mubr.msk.bf16.gmra.mrb[60].mxu0 %vm506_vm1, %v497_v54  ;;  %v2092_v54 = vld [vmem:[%s2753_s5 + $0xd0] ss:$8 sps:$4 sm:$0xff]  }
  0x97   : > { %846 = vmatprep.mubr.bf16.mxu0 %v2163_v3  ;;  %1410 = vmatpush1.bf16.msra.mxu1 %v2092_v54 }
  0x98   : > { %1411 = vmatprep.subr.bf16.mxu1 %v2093_v56 }
  0x9b   : > { %1412 = vmatpush1.bf16.msra.mxu1 %v2095_v57 }
  0x9c   : > { %1413 = vmatprep.subr.bf16.mxu1 %v2096_v58 }
  0x9e   : > { %1885 = vmatmul.mubr.msk.bf16.vlgmr.msra.gmra.mrb[0].mxu0 %vm765_vm2, %v434_v61  ;;  %v2098_v61 = vld [vmem:[%s2753_s5 + $0xf0] ss:$8 sps:$4 sm:$0xff]  }
  0x9f   : > { %856 = vmatprep.mubr.bf16.mxu0 %v2163_v3  ;;  %1414 = vmatpush1.bf16.msra.mxu1 %v2098_v61 }
  0xa6   : > { %1886 = vmatmul.mubr.msk.bf16.gmra.mrb[4].mxu0 %vm765_vm2, %v435_v5  ;;  %v448_v5 = vpack.c.bf16 %v431_v4, %v430_v2 }
  0xa7   : > { %866 = vmatprep.mubr.bf16.mxu0 %v2163_v3 }
  0xae   : > { %1887 = vmatmul.mubr.msk.bf16.gmra.mrb[8].mxu0 %vm765_vm2, %v436_v12  ;;  %v1007_v12 = vld [vmem:[%s2752_s4] sm:$0x3] }
  0xaf   : > { %876 = vmatprep.mubr.bf16.mxu0 %v2163_v3  ;;  %v2536_v14 = vrot.slane %v1007_v12, %v1015_v13 }
  0xb6   : > { %1888 = vmatmul.mubr.msk.bf16.gmra.mrb[12].mxu0 %vm765_vm2, %v437_v19 }
  0xb7   : > { %886 = vmatprep.mubr.bf16.mxu0 %v2163_v3 }
  0xbe   : > { %1889 = vmatmul.mubr.msk.bf16.gmra.mrb[16].mxu0 %vm765_vm2, %v438_v26 }
  0xbf   : > { %896 = vmatprep.mubr.bf16.mxu0 %v2163_v3 }
  0xc6   : > { %1890 = vmatmul.mubr.msk.bf16.gmra.mrb[20].mxu0 %vm765_vm2, %v439_v33 }
  0xc7   : > { %906 = vmatprep.mubr.bf16.mxu0 %v2163_v3 }
  0xce   : > { %1891 = vmatmul.mubr.msk.bf16.gmra.mrb[24].mxu0 %vm765_vm2, %v440_v39 }
  0xcf   : > { %916 = vmatprep.mubr.bf16.mxu0 %v2163_v3 }
  0xd6   : > { %1892 = vmatmul.mubr.msk.bf16.gmra.mrb[28].mxu0 %vm765_vm2, %v441_v42 }
  0xd7   : > { %926 = vmatprep.mubr.bf16.mxu0 %v2163_v3 }
  0xde   : > { %1893 = vmatmul.mubr.msk.bf16.gmra.mrb[32].mxu0 %vm765_vm2, %v442_v45 }
  0xdf   : > { %936 = vmatprep.mubr.bf16.mxu0 %v2163_v3 }
  0xe6   : > { %1894 = vmatmul.mubr.msk.bf16.gmra.mrb[36].mxu0 %vm765_vm2, %v443_v48 }
  0xe7   : > { %946 = vmatprep.mubr.bf16.mxu0 %v2163_v3 }
  0xee   : > { %1895 = vmatmul.mubr.msk.bf16.gmra.mrb[40].mxu0 %vm765_vm2, %v444_v51 }
  0xef   : > { %956 = vmatprep.mubr.bf16.mxu0 %v2163_v3 }
  0xf6   : > { %1896 = vmatmul.mubr.msk.bf16.gmra.mrb[44].mxu0 %vm765_vm2, %v445_v55 }
  0xf7   : > { %966 = vmatprep.mubr.bf16.mxu0 %v2163_v3 }
  0xfe   : > { %1897 = vmatmul.mubr.msk.bf16.gmra.mrb[48].mxu0 %vm765_vm2, %v446_v62 }
  0xff   : > { %976 = vmatprep.mubr.bf16.mxu0 %v2163_v3 }
 0x106   : > { %1898 = vmatmul.mubr.msk.bf16.gmra.mrb[52].mxu0 %vm765_vm2, %v447_v1 }
 0x107   : > { %986 = vmatprep.mubr.bf16.mxu0 %v2163_v3 }
 0x10e   : > { %1899 = vmatmul.mubr.msk.bf16.gmra.mrb[56].mxu0 %vm765_vm2, %v448_v5 }
 0x10f   : > { %996 = vmatprep.mubr.bf16.mxu0 %v2163_v3  ;;  %v2532_v3 = vrot.slane %v1007_v12, %v1011_v11 }
 0x116   : > { %1900 = vmatmul.mubr.msk.bf16.gmra.mrb[60].mxu0 %vm765_vm2, %v449_v8 }
 0x171   : > { %v848_v15 = vpop.f32.mrb[0].mxu0 }
 0x172   : > { %v1019_v16 = vadd.f32 %v2532_v3, %v848_v15  ;;  %v850_v17 = vpop.f32.mrb[1].mxu0 }
 0x173   : > { %v1020_v18 = vadd.f32 %v2536_v14, %v850_v17  ;;  %v852_v19 = vpop.f32.mrb[2].mxu0 }
 0x174   : > { %v1021_v20 = vadd.f32 %v2532_v3, %v852_v19  ;;  %v854_v21 = vpop.f32.mrb[3].mxu0  ;;  %v1083_v23 = vmax.f32 %v1019_v16, 0.0 }
 0x175   : > { %v1022_v22 = vadd.f32 %v2536_v14, %v854_v21  ;;  %v1084_v25 = vmax.f32 %v1020_v18, 0.0 }
 0x176   : > { %v1085_v24 = vmax.f32 %v1021_v20, 0.0 }
 0x177   : > { %v1086_v26 = vmax.f32 %v1022_v22, 0.0 }
 0x178   : > { %v1147_v27 = vpack.c.bf16 %v1085_v24, %v1083_v23 }
 0x179   : > { %v858_v28 = vpop.f32.mrb[4].mxu0  ;;  %v1148_v29 = vpack.c.bf16 %v1086_v26, %v1084_v25 }
 0x17a   : > { %v1023_v30 = vadd.f32 %v2532_v3, %v858_v28  ;;  %v860_v31 = vpop.f32.mrb[5].mxu0 }
 0x17b   : > { %v1024_v32 = vadd.f32 %v2536_v14, %v860_v31  ;;  %v862_v33 = vpop.f32.mrb[6].mxu0  ;;  %1415 = vmatprep.mubr.bf16.mxu1 %v1148_v29 }
 0x17c   : > { %v1025_v34 = vadd.f32 %v2532_v3, %v862_v33  ;;  %v864_v35 = vpop.f32.mrb[7].mxu0  ;;  %1416 = vmatmul.mubr.bf16.vlgmr.msra.gmra.mrb[0].mxu1 %v1147_v27  ;;  %v1087_v37 = vmax.f32 %v1023_v30, 0.0 }
 0x17d   : > { %v1026_v36 = vadd.f32 %v2536_v14, %v864_v35  ;;  %v1088_v39 = vmax.f32 %v1024_v32, 0.0 }
 0x17e   : > { %v1089_v38 = vmax.f32 %v1025_v34, 0.0 }
 0x17f   : > { %v1090_v40 = vmax.f32 %v1026_v36, 0.0 }
 0x180   : > { %v1149_v41 = vpack.c.bf16 %v1089_v38, %v1087_v37 }
 0x181   : > { %v1150_v42 = vpack.c.bf16 %v1090_v40, %v1088_v39  ;;  %v868_v43 = vpop.f32.mrb[8].mxu0 }
 0x182   : > { %v1027_v44 = vadd.f32 %v2532_v3, %v868_v43  ;;  %v870_v45 = vpop.f32.mrb[9].mxu0 }
 0x183   : > { %v1028_v46 = vadd.f32 %v2536_v14, %v870_v45  ;;  %v872_v47 = vpop.f32.mrb[10].mxu0  ;;  %1425 = vmatprep.mubr.bf16.mxu1 %v1150_v42 }
 0x184   : > { %v1029_v48 = vadd.f32 %v2532_v3, %v872_v47  ;;  %v874_v49 = vpop.f32.mrb[11].mxu0  ;;  %1426 = vmatmul.mubr.bf16.gmra.mrb[4].mxu1 %v1149_v41  ;;  %v1091_v51 = vmax.f32 %v1027_v44, 0.0 }
 0x185   : > { %v1030_v50 = vadd.f32 %v2536_v14, %v874_v49  ;;  %v1092_v53 = vmax.f32 %v1028_v46, 0.0 }
 0x186   : > { %v1093_v52 = vmax.f32 %v1029_v48, 0.0 }
 0x187   : > { %v1094_v54 = vmax.f32 %v1030_v50, 0.0 }
 0x188   : > { %v1151_v55 = vpack.c.bf16 %v1093_v52, %v1091_v51 }
 0x189   : > { %v1152_v56 = vpack.c.bf16 %v1094_v54, %v1092_v53  ;;  %v878_v57 = vpop.f32.mrb[12].mxu0 }
 0x18a   : > { %v1031_v58 = vadd.f32 %v2532_v3, %v878_v57  ;;  %v880_v59 = vpop.f32.mrb[13].mxu0 }
 0x18b   : > { %v1032_v60 = vadd.f32 %v2536_v14, %v880_v59  ;;  %v882_v61 = vpop.f32.mrb[14].mxu0  ;;  %1435 = vmatprep.mubr.bf16.mxu1 %v1152_v56 }
 0x18c   : > { %v1033_v62 = vadd.f32 %v2532_v3, %v882_v61  ;;  %v884_v63 = vpop.f32.mrb[15].mxu0  ;;  %1436 = vmatmul.mubr.bf16.gmra.mrb[8].mxu1 %v1151_v55  ;;  %v1095_v1 = vmax.f32 %v1031_v58, 0.0 }
 0x18d   : > { %v1034_v0 = vadd.f32 %v2536_v14, %v884_v63  ;;  %v1096_v4 = vmax.f32 %v1032_v60, 0.0 }
 0x18e   : > { %v1097_v2 = vmax.f32 %v1033_v62, 0.0 }
 0x18f   : > { %v1098_v5 = vmax.f32 %v1034_v0, 0.0 }
 0x190   : > { %v1153_v6 = vpack.c.bf16 %v1097_v2, %v1095_v1 }
 0x191   : > { %v1154_v7 = vpack.c.bf16 %v1098_v5, %v1096_v4  ;;  %v888_v8 = vpop.f32.mrb[16].mxu0 }
 0x192   : > { %v1035_v12 = vadd.f32 %v2532_v3, %v888_v8  ;;  %v890_v15 = vpop.f32.mrb[17].mxu0 }
 0x193   : > { %v1036_v16 = vadd.f32 %v2536_v14, %v890_v15  ;;  %v892_v17 = vpop.f32.mrb[18].mxu0  ;;  %1445 = vmatprep.mubr.bf16.mxu1 %v1154_v7 }
 0x194   : > { %v1037_v18 = vadd.f32 %v2532_v3, %v892_v17  ;;  %v894_v19 = vpop.f32.mrb[19].mxu0  ;;  %1446 = vmatmul.mubr.bf16.gmra.mrb[12].mxu1 %v1153_v6  ;;  %v1099_v21 = vmax.f32 %v1035_v12, 0.0 }
 0x195   : > { %v1038_v20 = vadd.f32 %v2536_v14, %v894_v19  ;;  %v1100_v23 = vmax.f32 %v1036_v16, 0.0 }
 0x196   : > { %v1101_v22 = vmax.f32 %v1037_v18, 0.0 }
 0x197   : > { %v1102_v24 = vmax.f32 %v1038_v20, 0.0 }
 0x198   : > { %v1155_v25 = vpack.c.bf16 %v1101_v22, %v1099_v21 }
 0x199   : > { %v1156_v26 = vpack.c.bf16 %v1102_v24, %v1100_v23  ;;  %v898_v27 = vpop.f32.mrb[20].mxu0 }
 0x19a   : > { %v1039_v28 = vadd.f32 %v2532_v3, %v898_v27  ;;  %v900_v29 = vpop.f32.mrb[21].mxu0 }
 0x19b   : > { %v1040_v30 = vadd.f32 %v2536_v14, %v900_v29  ;;  %v902_v31 = vpop.f32.mrb[22].mxu0  ;;  %1455 = vmatprep.mubr.bf16.mxu1 %v1156_v26 }
 0x19c   : > { %v1041_v32 = vadd.f32 %v2532_v3, %v902_v31  ;;  %v904_v33 = vpop.f32.mrb[23].mxu0  ;;  %1456 = vmatmul.mubr.bf16.gmra.mrb[16].mxu1 %v1155_v25  ;;  %v1103_v35 = vmax.f32 %v1039_v28, 0.0 }
 0x19d   : > { %v1042_v34 = vadd.f32 %v2536_v14, %v904_v33  ;;  %v1104_v37 = vmax.f32 %v1040_v30, 0.0 }
 0x19e   : > { %v1105_v36 = vmax.f32 %v1041_v32, 0.0 }
 0x19f   : > { %v1106_v38 = vmax.f32 %v1042_v34, 0.0 }
 0x1a0   : > { %v1157_v39 = vpack.c.bf16 %v1105_v36, %v1103_v35 }
 0x1a1   : > { %v1158_v40 = vpack.c.bf16 %v1106_v38, %v1104_v37  ;;  %v908_v41 = vpop.f32.mrb[24].mxu0 }
 0x1a2   : > { %v1043_v42 = vadd.f32 %v2532_v3, %v908_v41  ;;  %v910_v43 = vpop.f32.mrb[25].mxu0 }
 0x1a3   : > { %v1044_v44 = vadd.f32 %v2536_v14, %v910_v43  ;;  %v912_v45 = vpop.f32.mrb[26].mxu0  ;;  %1465 = vmatprep.mubr.bf16.mxu1 %v1158_v40 }
 0x1a4   : > { %v1045_v46 = vadd.f32 %v2532_v3, %v912_v45  ;;  %v914_v47 = vpop.f32.mrb[27].mxu0  ;;  %1466 = vmatmul.mubr.bf16.gmra.mrb[20].mxu1 %v1157_v39  ;;  %v1107_v49 = vmax.f32 %v1043_v42, 0.0 }
 0x1a5   : > { %v1046_v48 = vadd.f32 %v2536_v14, %v914_v47  ;;  %v1108_v51 = vmax.f32 %v1044_v44, 0.0 }
 0x1a6   : > { %v1109_v50 = vmax.f32 %v1045_v46, 0.0 }
 0x1a7   : > { %v1110_v52 = vmax.f32 %v1046_v48, 0.0 }
 0x1a8   : > { %v1159_v53 = vpack.c.bf16 %v1109_v50, %v1107_v49 }
 0x1a9   : > { %v1160_v54 = vpack.c.bf16 %v1110_v52, %v1108_v51  ;;  %v918_v55 = vpop.f32.mrb[28].mxu0 }
 0x1aa   : > { %v1047_v56 = vadd.f32 %v2532_v3, %v918_v55  ;;  %v920_v57 = vpop.f32.mrb[29].mxu0 }
 0x1ab   : > { %v1048_v58 = vadd.f32 %v2536_v14, %v920_v57  ;;  %v922_v59 = vpop.f32.mrb[30].mxu0  ;;  %1475 = vmatprep.mubr.bf16.mxu1 %v1160_v54 }
 0x1ac   : > { %v1049_v60 = vadd.f32 %v2532_v3, %v922_v59  ;;  %v924_v61 = vpop.f32.mrb[31].mxu0  ;;  %1476 = vmatmul.mubr.bf16.gmra.mrb[24].mxu1 %v1159_v53  ;;  %v1111_v63 = vmax.f32 %v1047_v56, 0.0 }
 0x1ad   : > { %v1050_v62 = vadd.f32 %v2536_v14, %v924_v61  ;;  %v1112_v1 = vmax.f32 %v1048_v58, 0.0 }
 0x1ae   : > { %v1113_v0 = vmax.f32 %v1049_v60, 0.0 }
 0x1af   : > { %v1114_v2 = vmax.f32 %v1050_v62, 0.0 }
 0x1b0   : > { %v1161_v4 = vpack.c.bf16 %v1113_v0, %v1111_v63 }
 0x1b1   : > { %v1162_v5 = vpack.c.bf16 %v1114_v2, %v1112_v1  ;;  %v928_v6 = vpop.f32.mrb[32].mxu0 }
 0x1b2   : > { %v1051_v7 = vadd.f32 %v2532_v3, %v928_v6  ;;  %v930_v8 = vpop.f32.mrb[33].mxu0 }
 0x1b3   : > { %v1052_v12 = vadd.f32 %v2536_v14, %v930_v8  ;;  %v932_v15 = vpop.f32.mrb[34].mxu0  ;;  %1485 = vmatprep.mubr.bf16.mxu1 %v1162_v5 }
 0x1b4   : > { %v1053_v16 = vadd.f32 %v2532_v3, %v932_v15  ;;  %v934_v17 = vpop.f32.mrb[35].mxu0  ;;  %1486 = vmatmul.mubr.bf16.gmra.mrb[28].mxu1 %v1161_v4  ;;  %v1115_v19 = vmax.f32 %v1051_v7, 0.0 }
 0x1b5   : > { %v1054_v18 = vadd.f32 %v2536_v14, %v934_v17  ;;  %v1116_v21 = vmax.f32 %v1052_v12, 0.0 }
 0x1b6   : > { %v1117_v20 = vmax.f32 %v1053_v16, 0.0 }
 0x1b7   : > { %v1118_v22 = vmax.f32 %v1054_v18, 0.0 }
 0x1b8   : > { %v1163_v23 = vpack.c.bf16 %v1117_v20, %v1115_v19 }
 0x1b9   : > { %v1164_v24 = vpack.c.bf16 %v1118_v22, %v1116_v21  ;;  %v938_v25 = vpop.f32.mrb[36].mxu0 }
 0x1ba   : > { %v1055_v26 = vadd.f32 %v2532_v3, %v938_v25  ;;  %v940_v27 = vpop.f32.mrb[37].mxu0 }
 0x1bb   : > { %v1056_v28 = vadd.f32 %v2536_v14, %v940_v27  ;;  %v942_v29 = vpop.f32.mrb[38].mxu0  ;;  %1495 = vmatprep.mubr.bf16.mxu1 %v1164_v24 }
 0x1bc   : > { %v1057_v30 = vadd.f32 %v2532_v3, %v942_v29  ;;  %v944_v31 = vpop.f32.mrb[39].mxu0  ;;  %1496 = vmatmul.mubr.bf16.gmra.mrb[32].mxu1 %v1163_v23  ;;  %v1119_v33 = vmax.f32 %v1055_v26, 0.0 }
 0x1bd   : > { %v1058_v32 = vadd.f32 %v2536_v14, %v944_v31  ;;  %v1120_v35 = vmax.f32 %v1056_v28, 0.0 }
 0x1be   : > { %v1121_v34 = vmax.f32 %v1057_v30, 0.0 }
 0x1bf   : > { %v1122_v36 = vmax.f32 %v1058_v32, 0.0 }
 0x1c0   : > { %v1165_v37 = vpack.c.bf16 %v1121_v34, %v1119_v33 }
 0x1c1   : > { %v1166_v38 = vpack.c.bf16 %v1122_v36, %v1120_v35  ;;  %v948_v39 = vpop.f32.mrb[40].mxu0 }
 0x1c2   : > { %v1059_v40 = vadd.f32 %v2532_v3, %v948_v39  ;;  %v950_v41 = vpop.f32.mrb[41].mxu0 }
 0x1c3   : > { %v1060_v42 = vadd.f32 %v2536_v14, %v950_v41  ;;  %v952_v43 = vpop.f32.mrb[42].mxu0  ;;  %1505 = vmatprep.mubr.bf16.mxu1 %v1166_v38 }
 0x1c4   : > { %v1061_v44 = vadd.f32 %v2532_v3, %v952_v43  ;;  %v954_v45 = vpop.f32.mrb[43].mxu0  ;;  %1506 = vmatmul.mubr.bf16.gmra.mrb[36].mxu1 %v1165_v37  ;;  %v1123_v47 = vmax.f32 %v1059_v40, 0.0 }
 0x1c5   : > { %v1062_v46 = vadd.f32 %v2536_v14, %v954_v45  ;;  %v1124_v49 = vmax.f32 %v1060_v42, 0.0 }
 0x1c6   : > { %v1125_v48 = vmax.f32 %v1061_v44, 0.0 }
 0x1c7   : > { %v1126_v50 = vmax.f32 %v1062_v46, 0.0 }
 0x1c8   : > { %v1167_v51 = vpack.c.bf16 %v1125_v48, %v1123_v47 }
 0x1c9   : > { %v1168_v52 = vpack.c.bf16 %v1126_v50, %v1124_v49  ;;  %v958_v53 = vpop.f32.mrb[44].mxu0 }
 0x1ca   : > { %v1063_v54 = vadd.f32 %v2532_v3, %v958_v53  ;;  %v960_v55 = vpop.f32.mrb[45].mxu0 }
 0x1cb   : > { %v1064_v56 = vadd.f32 %v2536_v14, %v960_v55  ;;  %v962_v57 = vpop.f32.mrb[46].mxu0  ;;  %1515 = vmatprep.mubr.bf16.mxu1 %v1168_v52 }
 0x1cc   : > { %v1065_v58 = vadd.f32 %v2532_v3, %v962_v57  ;;  %v964_v59 = vpop.f32.mrb[47].mxu0  ;;  %1516 = vmatmul.mubr.bf16.gmra.mrb[40].mxu1 %v1167_v51  ;;  %v1127_v61 = vmax.f32 %v1063_v54, 0.0 }
 0x1cd   : > { %v1066_v60 = vadd.f32 %v2536_v14, %v964_v59  ;;  %v1128_v63 = vmax.f32 %v1064_v56, 0.0 }
 0x1ce   : > { %v1129_v62 = vmax.f32 %v1065_v58, 0.0 }
 0x1cf   : > { %v1130_v0 = vmax.f32 %v1066_v60, 0.0 }
 0x1d0   : > { %v1169_v1 = vpack.c.bf16 %v1129_v62, %v1127_v61 }
 0x1d1   : > { %v1170_v2 = vpack.c.bf16 %v1130_v0, %v1128_v63  ;;  %v968_v4 = vpop.f32.mrb[48].mxu0 }
 0x1d2   : > { %v1067_v5 = vadd.f32 %v2532_v3, %v968_v4  ;;  %v970_v6 = vpop.f32.mrb[49].mxu0 }
 0x1d3   : > { %v1068_v7 = vadd.f32 %v2536_v14, %v970_v6  ;;  %v972_v8 = vpop.f32.mrb[50].mxu0  ;;  %1525 = vmatprep.mubr.bf16.mxu1 %v1170_v2  ;;  %v2164_v6 = vmov 1966171168  }
 0x1d4   : > { %v1069_v12 = vadd.f32 %v2532_v3, %v972_v8  ;;  %v974_v15 = vpop.f32.mrb[51].mxu0  ;;  %1526 = vmatmul.mubr.bf16.gmra.mrb[44].mxu1 %v1169_v1  ;;  %v1131_v17 = vmax.f32 %v1067_v5, 0.0  ;;  %v1211_v1 = vld [vmem:[%s2754_s6] sm:$0x3] }
 0x1d5   : > { %v1070_v16 = vadd.f32 %v2536_v14, %v974_v15  ;;  %v1132_v19 = vmax.f32 %v1068_v7, 0.0  ;;  %v2607_v2 = vrot.slane %v1211_v1, %v1011_v11  ;;  %v1685_v7 = vunpack.c.l.s4 %v2164_v6  ;;  %v2619_v11 = vld.sshfl [vmem:[%s2755_s7] sm:$0x11 pattern:$0x75316420] }
 0x1d6   : > { %v1133_v18 = vmax.f32 %v1069_v12, 0.0 }
 0x1d7   : > { %v1134_v20 = vmax.f32 %v1070_v16, 0.0 }
 0x1d8   : > { %v1171_v21 = vpack.c.bf16 %v1133_v18, %v1131_v17  ;;  %v1686_v17 = vunpack.c.0.s8 %v1685_v7  ;;  %v1683_v18 = vcombine.high %v2619_v11, %v2619_v11 }
 0x1d9   : > { %v1172_v22 = vpack.c.bf16 %v1134_v20, %v1132_v19  ;;  %v978_v23 = vpop.f32.mrb[52].mxu0 }
 0x1da   : > { %v1071_v24 = vadd.f32 %v2532_v3, %v978_v23  ;;  %v980_v25 = vpop.f32.mrb[53].mxu0 }
 0x1db   : > { %v1072_v26 = vadd.f32 %v2536_v14, %v980_v25  ;;  %v982_v27 = vpop.f32.mrb[54].mxu0  ;;  %1535 = vmatprep.mubr.bf16.mxu1 %v1172_v22 }
 0x1dc   : > { %v1073_v28 = vadd.f32 %v2532_v3, %v982_v27  ;;  %v984_v29 = vpop.f32.mrb[55].mxu0  ;;  %1536 = vmatmul.mubr.bf16.gmra.mrb[48].mxu1 %v1171_v21  ;;  %v1135_v31 = vmax.f32 %v1071_v24, 0.0  ;;  %v2625_v21 = vsub.s32 %v1686_v17, %v2523_v10 }
 0x1dd   : > { %v1074_v30 = vadd.f32 %v2536_v14, %v984_v29  ;;  %v1136_v33 = vmax.f32 %v1072_v26, 0.0 }
 0x1de   : > { %v1137_v32 = vmax.f32 %v1073_v28, 0.0  ;;  %v1697_v25 = vrot.slane %v1683_v18, %v2625_v21 }
 0x1df   : > { %v1138_v34 = vmax.f32 %v1074_v30, 0.0 }
 0x1e0   : > { %v1173_v35 = vpack.c.bf16 %v1137_v32, %v1135_v31 }
 0x1e1   : > { %v1174_v36 = vpack.c.bf16 %v1138_v34, %v1136_v33  ;;  %v988_v37 = vpop.f32.mrb[56].mxu0 }
 0x1e2   : > { %v1075_v38 = vadd.f32 %v2532_v3, %v988_v37  ;;  %v990_v39 = vpop.f32.mrb[57].mxu0 }
 0x1e3   : > { %v1076_v40 = vadd.f32 %v2536_v14, %v990_v39  ;;  %v992_v41 = vpop.f32.mrb[58].mxu0  ;;  %1545 = vmatprep.mubr.bf16.mxu1 %v1174_v36 }
 0x1e4   : > { %v1077_v42 = vadd.f32 %v2532_v3, %v992_v41  ;;  %v994_v43 = vpop.f32.mrb[59].mxu0  ;;  %1546 = vmatmul.mubr.bf16.gmra.mrb[52].mxu1 %v1173_v35  ;;  %v1139_v45 = vmax.f32 %v1075_v38, 0.0 }
 0x1e5   : > { %v1078_v44 = vadd.f32 %v2536_v14, %v994_v43  ;;  %v1140_v47 = vmax.f32 %v1076_v40, 0.0 }
 0x1e6   : > { %v1141_v46 = vmax.f32 %v1077_v42, 0.0 }
 0x1e7   : > { %v1142_v48 = vmax.f32 %v1078_v44, 0.0 }
 0x1e8   : > { %v1175_v49 = vpack.c.bf16 %v1141_v46, %v1139_v45 }
 0x1e9   : > { %v1176_v50 = vpack.c.bf16 %v1142_v48, %v1140_v47  ;;  %v998_v51 = vpop.f32.mrb[60].mxu0 }
 0x1ea   : > { %v1079_v52 = vadd.f32 %v2532_v3, %v998_v51  ;;  %v1000_v53 = vpop.f32.mrb[61].mxu0 }
 0x1eb   : > { %v1080_v54 = vadd.f32 %v2536_v14, %v1000_v53  ;;  %v1002_v55 = vpop.f32.mrb[62].mxu0  ;;  %1555 = vmatprep.mubr.bf16.mxu1 %v1176_v50 }
 0x1ec   : > { %v1081_v56 = vadd.f32 %v2532_v3, %v1002_v55  ;;  %v1004_v57 = vpop.f32.mrb[63].mxu0  ;;  %1556 = vmatmul.mubr.bf16.gmra.mrb[56].mxu1 %v1175_v49  ;;  %v1143_v59 = vmax.f32 %v1079_v52, 0.0  ;;  %v2611_v3 = vrot.slane %v1211_v1, %v1015_v13 }
 0x1ed   : > { %v1082_v58 = vadd.f32 %v2536_v14, %v1004_v57  ;;  %v1144_v61 = vmax.f32 %v1080_v54, 0.0 }
 0x1ee   : > { %v1145_v60 = vmax.f32 %v1081_v56, 0.0 }
 0x1ef   : > { %v1146_v62 = vmax.f32 %v1082_v58, 0.0 }
 0x1f0   : > { %v1177_v63 = vpack.c.bf16 %v1145_v60, %v1143_v59 }
 0x1f1   : > { %v1178_v0 = vpack.c.bf16 %v1146_v62, %v1144_v61 }
 0x1f3   : > { %1565 = vmatprep.mubr.bf16.mxu1 %v1178_v0 }
 0x1f4   : > { %1566 = vmatmul.mubr.bf16.gmra.mrb[60].mxu1 %v1177_v63 }
 0x1f5   : > { %1732 = vmatprep.mubr.bf16.mxu1 %v1697_v25 }
 0x24f   : > { %v1417_v14 = vpop.f32.mrb[0].mxu1 }
 0x250   : > { %v1418_v4 = vadd.f32 %v1417_v14, %v2607_v2  ;;  %v1419_v5 = vpop.f32.mrb[1].mxu1 }
 0x251   : > { %v1420_v8 = vadd.f32 %v1419_v5, %v2611_v3  ;;  %v1421_v12 = vpop.f32.mrb[2].mxu1 }
 0x252   : > { %v1422_v15 = vadd.f32 %v1421_v12, %v2607_v2  ;;  %v1423_v16 = vpop.f32.mrb[3].mxu1  ;;  %v1576_v19 = vmax.f32 %v1418_v4, 0.0 }
 0x253   : > { %v1424_v13 = vadd.f32 %v1423_v16, %v2611_v3  ;;  %v1577_v22 = vmax.f32 %v1420_v8, 0.0 }
 0x254   : > { %v1578_v20 = vmax.f32 %v1422_v15, 0.0 }
 0x255   : > { %v1579_v23 = vmax.f32 %v1424_v13, 0.0 }
 0x256   : > { %v1641_v24 = vpack.c.bf16 %v1578_v20, %v1576_v19 }
 0x257   : > { %v1642_v26 = vpack.c.bf16 %v1579_v23, %v1577_v22  ;;  %v1427_v27 = vpop.f32.mrb[4].mxu1 }
 0x258   : > { %v1428_v28 = vadd.f32 %v1427_v27, %v2607_v2  ;;  %v1429_v29 = vpop.f32.mrb[5].mxu1 }
 0x259   : > { %v1430_v30 = vadd.f32 %v1429_v29, %v2611_v3  ;;  %v1431_v31 = vpop.f32.mrb[6].mxu1  ;;  %1700 = vmatprep.subr.bf16.mxu1 %v1642_v26 }
 0x25a   : > { %v1432_v32 = vadd.f32 %v1431_v31, %v2607_v2  ;;  %v1433_v33 = vpop.f32.mrb[7].mxu1  ;;  %1701 = vmatpush1.bf16.xpose.msra.mxu1 %v1641_v24  ;;  %v1580_v34 = vmax.f32 %v1428_v28, 0.0 }
 0x25b   : > { %v1434_v10 = vadd.f32 %v1433_v33, %v2611_v3  ;;  %v1581_v36 = vmax.f32 %v1430_v30, 0.0 }
 0x25c   : > { %v1582_v35 = vmax.f32 %v1432_v32, 0.0 }
 0x25d   : > { %v1583_v37 = vmax.f32 %v1434_v10, 0.0 }
 0x25e   : > { %v1643_v38 = vpack.c.bf16 %v1582_v35, %v1580_v34 }
 0x25f   : > { %v1644_v39 = vpack.c.bf16 %v1583_v37, %v1581_v36  ;;  %v1437_v40 = vpop.f32.mrb[8].mxu1 }
 0x260   : > { %v1438_v41 = vadd.f32 %v1437_v40, %v2607_v2  ;;  %v1439_v42 = vpop.f32.mrb[9].mxu1 }
 0x261   : > { %v1440_v43 = vadd.f32 %v1439_v42, %v2611_v3  ;;  %v1441_v44 = vpop.f32.mrb[10].mxu1  ;;  %1702 = vmatprep.subr.bf16.mxu1 %v1644_v39 }
 0x262   : > { %v1442_v45 = vadd.f32 %v1441_v44, %v2607_v2  ;;  %v1443_v46 = vpop.f32.mrb[11].mxu1  ;;  %1703 = vmatpush1.bf16.xpose.msra.mxu1 %v1643_v38  ;;  %v1584_v48 = vmax.f32 %v1438_v41, 0.0 }
 0x263   : > { %v1444_v47 = vadd.f32 %v1443_v46, %v2611_v3  ;;  %v1585_v50 = vmax.f32 %v1440_v43, 0.0 }
 0x264   : > { %v1586_v49 = vmax.f32 %v1442_v45, 0.0 }
 0x265   : > { %v1587_v51 = vmax.f32 %v1444_v47, 0.0 }
 0x266   : > { %v1645_v52 = vpack.c.bf16 %v1586_v49, %v1584_v48 }
 0x267   : > { %v1646_v53 = vpack.c.bf16 %v1587_v51, %v1585_v50  ;;  %v1447_v54 = vpop.f32.mrb[12].mxu1 }
 0x268   : > { %v1448_v55 = vadd.f32 %v1447_v54, %v2607_v2  ;;  %v1449_v56 = vpop.f32.mrb[13].mxu1 }
 0x269   : > { %v1450_v57 = vadd.f32 %v1449_v56, %v2611_v3  ;;  %v1451_v58 = vpop.f32.mrb[14].mxu1  ;;  %1704 = vmatprep.subr.bf16.mxu1 %v1646_v53 }
 0x26a   : > { %v1452_v59 = vadd.f32 %v1451_v58, %v2607_v2  ;;  %v1453_v60 = vpop.f32.mrb[15].mxu1  ;;  %1705 = vmatpush1.bf16.xpose.msra.mxu1 %v1645_v52  ;;  %v1588_v62 = vmax.f32 %v1448_v55, 0.0 }
 0x26b   : > { %v1454_v61 = vadd.f32 %v1453_v60, %v2611_v3  ;;  %v1589_v0 = vmax.f32 %v1450_v57, 0.0 }
 0x26c   : > { %v1590_v63 = vmax.f32 %v1452_v59, 0.0 }
 0x26d   : > { %v1591_v1 = vmax.f32 %v1454_v61, 0.0 }
 0x26e   : > { %v1647_v14 = vpack.c.bf16 %v1590_v63, %v1588_v62 }
 0x26f   : > { %v1648_v4 = vpack.c.bf16 %v1591_v1, %v1589_v0  ;;  %v1457_v5 = vpop.f32.mrb[16].mxu1 }
 0x270   : > { %v1458_v6 = vadd.f32 %v1457_v5, %v2607_v2  ;;  %v1459_v7 = vpop.f32.mrb[17].mxu1 }
 0x271   : > { %v1460_v8 = vadd.f32 %v1459_v7, %v2611_v3  ;;  %v1461_v12 = vpop.f32.mrb[18].mxu1  ;;  %1706 = vmatprep.subr.bf16.mxu1 %v1648_v4 }
 0x272   : > { %v1462_v15 = vadd.f32 %v1461_v12, %v2607_v2  ;;  %v1463_v16 = vpop.f32.mrb[19].mxu1  ;;  %1707 = vmatpush1.bf16.xpose.msra.mxu1 %v1647_v14  ;;  %v1592_v13 = vmax.f32 %v1458_v6, 0.0 }
 0x273   : > { %v1464_v17 = vadd.f32 %v1463_v16, %v2611_v3  ;;  %v1593_v19 = vmax.f32 %v1460_v8, 0.0 }
 0x274   : > { %v1594_v18 = vmax.f32 %v1462_v15, 0.0 }
 0x275   : > { %v1595_v20 = vmax.f32 %v1464_v17, 0.0 }
 0x276   : > { %v1649_v22 = vpack.c.bf16 %v1594_v18, %v1592_v13 }
 0x277   : > { %v1650_v23 = vpack.c.bf16 %v1595_v20, %v1593_v19  ;;  %v1467_v24 = vpop.f32.mrb[20].mxu1 }
 0x278   : > { %v1468_v25 = vadd.f32 %v1467_v24, %v2607_v2  ;;  %v1469_v26 = vpop.f32.mrb[21].mxu1 }
 0x279   : > { %v1470_v27 = vadd.f32 %v1469_v26, %v2611_v3  ;;  %v1471_v28 = vpop.f32.mrb[22].mxu1  ;;  %1708 = vmatprep.subr.bf16.mxu1 %v1650_v23 }
 0x27a   : > { %v1472_v29 = vadd.f32 %v1471_v28, %v2607_v2  ;;  %v1473_v30 = vpop.f32.mrb[23].mxu1  ;;  %1709 = vmatpush1.bf16.xpose.msra.mxu1 %v1649_v22  ;;  %v1596_v32 = vmax.f32 %v1468_v25, 0.0 }
 0x27b   : > { %v1474_v31 = vadd.f32 %v1473_v30, %v2611_v3  ;;  %v1597_v10 = vmax.f32 %v1470_v27, 0.0 }
 0x27c   : > { %v1598_v33 = vmax.f32 %v1472_v29, 0.0 }
 0x27d   : > { %v1599_v34 = vmax.f32 %v1474_v31, 0.0 }
 0x27e   : > { %v1651_v35 = vpack.c.bf16 %v1598_v33, %v1596_v32 }
 0x27f   : > { %v1652_v36 = vpack.c.bf16 %v1599_v34, %v1597_v10  ;;  %v1477_v37 = vpop.f32.mrb[24].mxu1 }
 0x280   : > { %v1478_v38 = vadd.f32 %v1477_v37, %v2607_v2  ;;  %v1479_v39 = vpop.f32.mrb[25].mxu1 }
 0x281   : > { %v1480_v40 = vadd.f32 %v1479_v39, %v2611_v3  ;;  %v1481_v41 = vpop.f32.mrb[26].mxu1  ;;  %1710 = vmatprep.subr.bf16.mxu1 %v1652_v36 }
 0x282   : > { %v1482_v42 = vadd.f32 %v1481_v41, %v2607_v2  ;;  %v1483_v43 = vpop.f32.mrb[27].mxu1  ;;  %1711 = vmatpush1.bf16.xpose.msra.mxu1 %v1651_v35  ;;  %v1600_v45 = vmax.f32 %v1478_v38, 0.0 }
 0x283   : > { %v1484_v44 = vadd.f32 %v1483_v43, %v2611_v3  ;;  %v1601_v47 = vmax.f32 %v1480_v40, 0.0 }
 0x284   : > { %v1602_v46 = vmax.f32 %v1482_v42, 0.0 }
 0x285   : > { %v1603_v48 = vmax.f32 %v1484_v44, 0.0 }
 0x286   : > { %v1653_v49 = vpack.c.bf16 %v1602_v46, %v1600_v45 }
 0x287   : > { %v1654_v50 = vpack.c.bf16 %v1603_v48, %v1601_v47  ;;  %v1487_v51 = vpop.f32.mrb[28].mxu1 }
 0x288   : > { %v1488_v52 = vadd.f32 %v1487_v51, %v2607_v2  ;;  %v1489_v53 = vpop.f32.mrb[29].mxu1 }
 0x289   : > { %v1490_v54 = vadd.f32 %v1489_v53, %v2611_v3  ;;  %v1491_v55 = vpop.f32.mrb[30].mxu1  ;;  %1712 = vmatprep.subr.bf16.mxu1 %v1654_v50 }
 0x28a   : > { %v1492_v56 = vadd.f32 %v1491_v55, %v2607_v2  ;;  %v1493_v57 = vpop.f32.mrb[31].mxu1  ;;  %1713 = vmatpush1.bf16.xpose.msra.mxu1 %v1653_v49  ;;  %v1604_v59 = vmax.f32 %v1488_v52, 0.0 }
 0x28b   : > { %v1494_v58 = vadd.f32 %v1493_v57, %v2611_v3  ;;  %v1605_v61 = vmax.f32 %v1490_v54, 0.0 }
 0x28c   : > { %v1606_v60 = vmax.f32 %v1492_v56, 0.0 }
 0x28d   : > { %v1607_v62 = vmax.f32 %v1494_v58, 0.0 }
 0x28e   : > { %v1655_v63 = vpack.c.bf16 %v1606_v60, %v1604_v59 }
 0x28f   : > { %v1656_v0 = vpack.c.bf16 %v1607_v62, %v1605_v61  ;;  %v1497_v1 = vpop.f32.mrb[32].mxu1 }
 0x290   : > { %v1498_v14 = vadd.f32 %v1497_v1, %v2607_v2  ;;  %v1499_v4 = vpop.f32.mrb[33].mxu1 }
 0x291   : > { %v1500_v5 = vadd.f32 %v1499_v4, %v2611_v3  ;;  %v1501_v6 = vpop.f32.mrb[34].mxu1  ;;  %1714 = vmatprep.subr.bf16.mxu1 %v1656_v0 }
 0x292   : > { %v1502_v7 = vadd.f32 %v1501_v6, %v2607_v2  ;;  %v1503_v8 = vpop.f32.mrb[35].mxu1  ;;  %1715 = vmatpush1.bf16.xpose.msra.mxu1 %v1655_v63  ;;  %v1608_v15 = vmax.f32 %v1498_v14, 0.0 }
 0x293   : > { %v1504_v12 = vadd.f32 %v1503_v8, %v2611_v3  ;;  %v1609_v17 = vmax.f32 %v1500_v5, 0.0 }
 0x294   : > { %v1610_v16 = vmax.f32 %v1502_v7, 0.0 }
 0x295   : > { %v1611_v13 = vmax.f32 %v1504_v12, 0.0 }
 0x296   : > { %v1657_v18 = vpack.c.bf16 %v1610_v16, %v1608_v15 }
 0x297   : > { %v1658_v19 = vpack.c.bf16 %v1611_v13, %v1609_v17  ;;  %v1507_v20 = vpop.f32.mrb[36].mxu1 }
 0x298   : > { %v1508_v22 = vadd.f32 %v1507_v20, %v2607_v2  ;;  %v1509_v23 = vpop.f32.mrb[37].mxu1 }
 0x299   : > { %v1510_v24 = vadd.f32 %v1509_v23, %v2611_v3  ;;  %v1511_v25 = vpop.f32.mrb[38].mxu1  ;;  %1716 = vmatprep.subr.bf16.mxu1 %v1658_v19 }
 0x29a   : > { %v1512_v26 = vadd.f32 %v1511_v25, %v2607_v2  ;;  %v1513_v27 = vpop.f32.mrb[39].mxu1  ;;  %1717 = vmatpush1.bf16.xpose.msra.mxu1 %v1657_v18  ;;  %v1612_v29 = vmax.f32 %v1508_v22, 0.0 }
 0x29b   : > { %v1514_v28 = vadd.f32 %v1513_v27, %v2611_v3  ;;  %v1613_v31 = vmax.f32 %v1510_v24, 0.0 }
 0x29c   : > { %v1614_v30 = vmax.f32 %v1512_v26, 0.0 }
 0x29d   : > { %v1615_v32 = vmax.f32 %v1514_v28, 0.0 }
 0x29e   : > { %v1659_v33 = vpack.c.bf16 %v1614_v30, %v1612_v29 }
 0x29f   : > { %v1660_v10 = vpack.c.bf16 %v1615_v32, %v1613_v31  ;;  %v1517_v34 = vpop.f32.mrb[40].mxu1 }
 0x2a0   : > { %v1518_v35 = vadd.f32 %v1517_v34, %v2607_v2  ;;  %v1519_v36 = vpop.f32.mrb[41].mxu1 }
 0x2a1   : > { %v1520_v37 = vadd.f32 %v1519_v36, %v2611_v3  ;;  %v1521_v38 = vpop.f32.mrb[42].mxu1  ;;  %1718 = vmatprep.subr.bf16.mxu1 %v1660_v10 }
 0x2a2   : > { %v1522_v39 = vadd.f32 %v1521_v38, %v2607_v2  ;;  %v1523_v40 = vpop.f32.mrb[43].mxu1  ;;  %1719 = vmatpush1.bf16.xpose.msra.mxu1 %v1659_v33  ;;  %v1616_v42 = vmax.f32 %v1518_v35, 0.0 }
 0x2a3   : > { %v1524_v41 = vadd.f32 %v1523_v40, %v2611_v3  ;;  %v1617_v44 = vmax.f32 %v1520_v37, 0.0 }
 0x2a4   : > { %v1618_v43 = vmax.f32 %v1522_v39, 0.0 }
 0x2a5   : > { %v1619_v45 = vmax.f32 %v1524_v41, 0.0 }
 0x2a6   : > { %v1661_v46 = vpack.c.bf16 %v1618_v43, %v1616_v42 }
 0x2a7   : > { %v1662_v47 = vpack.c.bf16 %v1619_v45, %v1617_v44  ;;  %v1527_v48 = vpop.f32.mrb[44].mxu1 }
 0x2a8   : > { %v1528_v49 = vadd.f32 %v1527_v48, %v2607_v2  ;;  %v1529_v50 = vpop.f32.mrb[45].mxu1 }
 0x2a9   : > { %v1530_v51 = vadd.f32 %v1529_v50, %v2611_v3  ;;  %v1531_v52 = vpop.f32.mrb[46].mxu1  ;;  %1720 = vmatprep.subr.bf16.mxu1 %v1662_v47 }
 0x2aa   : > { %v1532_v53 = vadd.f32 %v1531_v52, %v2607_v2  ;;  %v1533_v54 = vpop.f32.mrb[47].mxu1  ;;  %1721 = vmatpush1.bf16.xpose.msra.mxu1 %v1661_v46  ;;  %v1620_v56 = vmax.f32 %v1528_v49, 0.0 }
 0x2ab   : > { %v1534_v55 = vadd.f32 %v1533_v54, %v2611_v3  ;;  %v1621_v58 = vmax.f32 %v1530_v51, 0.0 }
 0x2ac   : > { %v1622_v57 = vmax.f32 %v1532_v53, 0.0 }
 0x2ad   : > { %v1623_v59 = vmax.f32 %v1534_v55, 0.0 }
 0x2ae   : > { %v1663_v60 = vpack.c.bf16 %v1622_v57, %v1620_v56 }
 0x2af   : > { %v1664_v61 = vpack.c.bf16 %v1623_v59, %v1621_v58  ;;  %v1537_v62 = vpop.f32.mrb[48].mxu1  ;;  %v1690_v59 = vrot.slane %v2619_v11, %v2625_v21 }
 0x2b0   : > { %v1538_v63 = vadd.f32 %v1537_v62, %v2607_v2  ;;  %v1539_v0 = vpop.f32.mrb[49].mxu1 }
 0x2b1   : > { %v1540_v1 = vadd.f32 %v1539_v0, %v2611_v3  ;;  %v1541_v14 = vpop.f32.mrb[50].mxu1  ;;  %1722 = vmatprep.subr.bf16.mxu1 %v1664_v61 }
 0x2b2   : > { %v1542_v4 = vadd.f32 %v1541_v14, %v2607_v2  ;;  %v1543_v5 = vpop.f32.mrb[51].mxu1  ;;  %1723 = vmatpush1.bf16.xpose.msra.mxu1 %v1663_v60  ;;  %v1624_v7 = vmax.f32 %v1538_v63, 0.0  ;;  %v1674_v60 = vstv %s1673_s10 }
 0x2b3   : > { %v1544_v6 = vadd.f32 %v1543_v5, %v2611_v3  ;;  %v1625_v12 = vmax.f32 %v1540_v1, 0.0 }
 0x2b4   : > { %v1626_v8 = vmax.f32 %v1542_v4, 0.0 }
 0x2b5   : > { %v1627_v15 = vmax.f32 %v1544_v6, 0.0 }
 0x2b6   : > { %v1665_v16 = vpack.c.bf16 %v1626_v8, %v1624_v7 }
 0x2b7   : > { %v1666_v17 = vpack.c.bf16 %v1627_v15, %v1625_v12  ;;  %v1547_v13 = vpop.f32.mrb[52].mxu1 }
 0x2b8   : > { %v1548_v18 = vadd.f32 %v1547_v13, %v2607_v2  ;;  %v1549_v19 = vpop.f32.mrb[53].mxu1 }
 0x2b9   : > { %v1550_v20 = vadd.f32 %v1549_v19, %v2611_v3  ;;  %v1551_v22 = vpop.f32.mrb[54].mxu1  ;;  %1724 = vmatprep.subr.bf16.mxu1 %v1666_v17 }
 0x2ba   : > { %v1552_v23 = vadd.f32 %v1551_v22, %v2607_v2  ;;  %v1553_v24 = vpop.f32.mrb[55].mxu1  ;;  %1725 = vmatpush1.bf16.xpose.msra.mxu1 %v1665_v16  ;;  %v1628_v26 = vmax.f32 %v1548_v18, 0.0 }
 0x2bb   : > { %v1554_v25 = vadd.f32 %v1553_v24, %v2611_v3  ;;  %v1629_v28 = vmax.f32 %v1550_v20, 0.0 }
 0x2bc   : > { %v1630_v27 = vmax.f32 %v1552_v23, 0.0 }
 0x2bd   : > { %v1631_v29 = vmax.f32 %v1554_v25, 0.0 }
 0x2be   : > { %v1667_v30 = vpack.c.bf16 %v1630_v27, %v1628_v26 }
 0x2bf   : > { %v1668_v31 = vpack.c.bf16 %v1631_v29, %v1629_v28  ;;  %v1557_v32 = vpop.f32.mrb[56].mxu1 }
 0x2c0   : > { %v1558_v33 = vadd.f32 %v1557_v32, %v2607_v2  ;;  %v1559_v10 = vpop.f32.mrb[57].mxu1 }
 0x2c1   : > { %v1560_v34 = vadd.f32 %v1559_v10, %v2611_v3  ;;  %v1561_v35 = vpop.f32.mrb[58].mxu1  ;;  %1726 = vmatprep.subr.bf16.mxu1 %v1668_v31 }
 0x2c2   : > { %v1562_v36 = vadd.f32 %v1561_v35, %v2607_v2  ;;  %v1563_v37 = vpop.f32.mrb[59].mxu1  ;;  %1727 = vmatpush1.bf16.xpose.msra.mxu1 %v1667_v30  ;;  %v1632_v39 = vmax.f32 %v1558_v33, 0.0 }
 0x2c3   : > { %v1564_v38 = vadd.f32 %v1563_v37, %v2611_v3  ;;  %v1633_v41 = vmax.f32 %v1560_v34, 0.0 }
 0x2c4   : > { %v1634_v40 = vmax.f32 %v1562_v36, 0.0 }
 0x2c5   : > { %v1635_v42 = vmax.f32 %v1564_v38, 0.0 }
 0x2c6   : > { %v1669_v43 = vpack.c.bf16 %v1634_v40, %v1632_v39 }
 0x2c7   : > { %v1670_v44 = vpack.c.bf16 %v1635_v42, %v1633_v41  ;;  %v1567_v45 = vpop.f32.mrb[60].mxu1 }
 0x2c8   : > { %v1568_v46 = vadd.f32 %v1567_v45, %v2607_v2  ;;  %v1569_v47 = vpop.f32.mrb[61].mxu1 }
 0x2c9   : > { %v1570_v48 = vadd.f32 %v1569_v47, %v2611_v3  ;;  %v1571_v49 = vpop.f32.mrb[62].mxu1  ;;  %1728 = vmatprep.subr.bf16.mxu1 %v1670_v44 }
 0x2ca   : > { %v1572_v50 = vadd.f32 %v1571_v49, %v2607_v2  ;;  %v1573_v51 = vpop.f32.mrb[63].mxu1  ;;  %1729 = vmatpush1.bf16.xpose.msra.mxu1 %v1669_v43  ;;  %v1636_v53 = vmax.f32 %v1568_v46, 0.0 }
 0x2cb   : > { %v1574_v52 = vadd.f32 %v1573_v51, %v2611_v3  ;;  %v1637_v55 = vmax.f32 %v1570_v48, 0.0 }
 0x2cc   : > { %v1638_v54 = vmax.f32 %v1572_v50, 0.0 }
 0x2cd   : > { %v1639_v56 = vmax.f32 %v1574_v52, 0.0 }
 0x2ce   : > { %v1671_v57 = vpack.c.bf16 %v1638_v54, %v1636_v53 }
 0x2cf   : > { %v1672_v58 = vpack.c.bf16 %v1639_v56, %v1637_v55 }
 0x2d1   : > { %1730 = vmatprep.subr.bf16.mxu1 %v1672_v58 }
 0x2d2   : > { %1731 = vmatpush1.bf16.xpose.msra.mxu1 %v1671_v57 }
 0x2d9   : > { %1733 = vmatmul.mubr.bf16.vlgmr.msra.gmra.mrb[64].mxu1 %v1690_v59 }
 0x3ac   : > { %v1734_v2 = vpop.f32.mrb[64].mxu1 }
 0x3ad   : > { %v1735_v61 = vadd.f32 %v1734_v2, %v1674_v60  ;;  %v1736_v62 = vpop.f32.mrb[65].mxu1 }
 0x3ae   : > { %v1737_v63 = vadd.f32 %v1736_v62, %v1674_v60  ;;  %v1738_v3 = vpop.f32.mrb[66].mxu1 }
 0x3af   : > { %v1739_v0 = vpop.f32.mrb[67].mxu1 }
 0x3b0   : > { %v1743_v1 = vcombine.low %v1735_v61, %v1737_v63  ;;  %1771 = sbr.rel (!%p2257_p5) target bundleno = 978 (0x3d2), region = 60 }
 0x3b2   : > { %v1750_v14 = vrot.slane %v1743_v1, %v2625_v21 }
 0x3b4   : > { %v1757_v4 = vrot.slane %v1750_v14, %v2625_v21 }
 0x3b6   : > { %1763 = vst.msk [vmem:[%s367_s27] sm:$0x3] %vm1761_vm3, %v1757_v4 }
 0x3b7   : > { %s2765_s18 = smov (!%p1774_p11, %s1773_s18), 2 }
 0x3b8   : > { %s2699_s22 = sshll.u32 %s2765_s18, 4 }
 0x3b9   : > { %s1778_s23 = ssub.s32 32, %s2699_s22 }
 0x3ba   : > { %1779 = vsyncadd %s2694_s28, %s1778_s23  ;;  %p1937_p12 = scmp.ne.s32.totalorder %s2699_s22, 0  ;;  %s2708_s20 = scalar_lea.hbm %s2757_s9, %s2271_s24 }
 0x3bb   : > { %s1784_s29 = sshll.u32 %s367_s27, 4  ;;  %s2165_s30 = smov [#allocation3]   ;;  %s1785_s29 = int_to_ptr.vmem [resolvable:$true] %s1784_s29 }
 0x3bc   : > { %s2099_s8 = scalar_lea.vmem %s1785_s29, %s2699_s22  ;;  %s2103_s10 = sshll.u32 %s2165_s30, 4  ;;  %s2104_s10 = int_to_ptr.vmem [resolvable:$false] %s2103_s10 }
 0x3bd   : > { %p2100_p13 = scmp.ne.s32.totalorder %s1785_s29, %s2099_s8  ;;  %s2105_s15 = scalar_lea.vmem %s2104_s10, 64 }
 0x3be   : > { %p2106_p2 = scmp.lt.s32.totalorder %s1785_s29, %s2104_s10  ;;  %p2107_p3 = scmp.lt.s32.totalorder %s2105_s15, %s2099_s8 }
 0x3bf   : > { %p2101_p0 = pnand %p2100_p13, %p1937_p12 }
 0x3c0   : > { %p2108_p4 = por %p2107_p3, %p2106_p2 }
 0x3c1   : > { %p2102_p1 = pneg %p2101_p0 }
 0x3c3   : > { %p2109_p5 = pnand %p2108_p4, %p2102_p1 }
 0x3c5   : > { %2112 = shalt.err (!%p2109_p5)
}
 0x3c6   : > { %s2113_s24 = scalar_lea.hbm %s2708_s20, %s2699_s22  ;;  %s2117_s18 = scalar_lea.hbm %s2757_s9, 48 }
 0x3c7   : > { %p2114_p7 = scmp.ne.s32.totalorder %s2708_s20, %s2113_s24  ;;  %p2118_p10 = scmp.lt.u32.totalorder %s2708_s20, %s2757_s9 }
 0x3c8   : > { %p2119_p11 = scmp.lt.u32.totalorder %s2117_s18, %s2113_s24  ;;  %p2121_p0 = scmp.lt.u32.totalorder %s2113_s24, %s2708_s20 }
 0x3c9   : > { %p2115_p8 = pnand %p2114_p7, %p1937_p12 }
 0x3ca   : > { %p2120_p13 = por %p2119_p11, %p2118_p10 }
 0x3cb   : > { %p2116_p9 = pneg %p2115_p8 }
 0x3cc   : > { %p2122_p1 = por %p2121_p0, %p2120_p13 }
 0x3ce   : > { %p2123_p2 = pnand %p2122_p1, %p2116_p9 }
 0x3d0   : > { %2126 = shalt.err (!%p2123_p2)
}
 0x3d1   : > { %1787 = dma.vmem_to_hbm [thread:$0]  (%p1937_p12), %s1785_s29, %s2699_s22, %s2708_s20, %s2694_s28  }
 0x3d2 PF: > { %p2011_p3 = scmp.ge.s32.totalorder %s2161_s14, 2  ;;  %s1796_s26 = sand.u32 1, %s2149_s11  }
 0x3d3   : > { %s1797_s8 = scalar_lea.sflag [#allocation4], %s1796_s26 }
 0x3d4   : > { %p2008_p4 = pnand %p2011_p3, %p2261_p6 }
 0x3d6   : > { %2144 = dma.done.wait (!%p2008_p4), %s1797_s8, 32  }
 0x3d7   : > { %2146 = vsyncadd (!%p2008_p4), %s1797_s8, 4294967264  ;;  %p20_p5 = scmp.ge.s32.totalorder %s2244_s16, 4   ;;  %s2760_s11 = smov %s2153_s12 }
 0x3d8   : > { %s2761_s12 = smov %s2157_s13  ;;  %s2762_s13 = smov %s2255_s19 }
 0x3d9   : > { %s2763_s14 = smov %s2244_s16  ;;  %22 = sbr.rel (!%p20_p5) target bundleno = 5 (0x5), region = 94 }
 0x3e0   :  { %1802 = vsyncpa [#allocation4], 1 }
 0x3e1   :  { %1804 = vsyncpa [#allocation4 + $0x1], 1 }

</bundles_post_ra>
